<compile_context>
chip_gen: v6e
topology: v6e:2x2x1
jax: 0.10.0
libtpu: 0.0.40
codegen_flags: <defaults>
</compile_context>

<pallas_src>
import functools
import math

import jax
import jax.numpy as jnp
from jax.experimental import pallas as pl
from jax.experimental.pallas import tpu as pltpu

LANE = 128  # TPU lane width; halo scratch pads one full lane-tile per side.


# ----------------------------------------------------------------------------
# Fused Pallas kernel: encoder + 8 conv blocks + Linear + Softplus
# ----------------------------------------------------------------------------
def fused_forward_kernel(idx_ref, wconv_ref, lin_w_ref, lin_b_ref, out_ref,
                         scr_ref, *, block_cfg, L, C):
    """Entire Model.forward in one kernel invocation.

    idx_ref   : (1, L)            int32 VMEM -- sequence indices in [0, 4)
    wconv_ref : (2*n_blocks, C, 3C) f32 VMEM -- tap-packed, zero-padded weights
    lin_w_ref : (C, 1)             f32  VMEM -- Linear weight (padded, column)
    lin_b_ref : (1,)               f32  SMEM -- Linear bias
    out_ref   : (1, L)             f32  VMEM
    scr_ref   : (C, L + 2*LANE)    f32  VMEM scratch -- lane-aligned halo buf
    """
    # Zero the halo scratch ONCE; later stores only touch the aligned interior,
    # so the two halo regions stay zero for every conv.
    scr_ref[...] = jnp.zeros(scr_ref.shape, scr_ref.dtype)

    def conv3(w, v):
        # 1x3 conv (stride 1, padding 1, no bias) as ONE MXU matmul:
        #   stack [v[:, j-1]; v[:, j]; v[:, j+1]] along channels -> (3C, L)
        #   then (C, 3C) @ (3C, L).
        scr_ref[:, LANE:LANE + L] = v                    # aligned store
        left = scr_ref[:, LANE - 1:LANE - 1 + L]         # v[:, j-1] (zero @ j=0)
        right = scr_ref[:, LANE + 1:LANE + 1 + L]        # v[:, j+1] (zero @ j=L-1)
        stacked = jnp.concatenate([left, v, right], axis=0)   # (3C, L), 8-aligned
        return jnp.dot(w, stacked, preferred_element_type=jnp.float32)

    # Encoder: one-hot to channels-first (C, L); rows >= 4 stay zero.
    ch = jax.lax.broadcasted_iota(jnp.int32, (C, L), 0)
    x = (ch == idx_ref[...]).astype(jnp.float32)

    # Conv blocks (fully unrolled; channel counts are static Python values).
    for bi, (cin, cout) in enumerate(block_cfg):
        h = conv3(wconv_ref[2 * bi], x)                  # conv1(x), pre-ReLU
        y = conv3(wconv_ref[2 * bi + 1], jnp.maximum(h, 0.0))
        base = x if cin == cout else h                   # PyTorch block's skip path
        x = jnp.maximum(base + y, 0.0)

    # Head: Linear(C -> 1) over every position as a VPU reduction + Softplus
    # (PyTorch beta=1, threshold=20).
    z = jnp.sum(lin_w_ref[...] * x, axis=0, keepdims=True) + lin_b_ref[0]
    out_ref[...] = jnp.where(z > 20.0, z, jnp.log1p(jnp.exp(jnp.minimum(z, 20.0))))


# ----------------------------------------------------------------------------
# Model structure helpers (mirror the PyTorch __init__)
# ----------------------------------------------------------------------------
def model_block_config(n_blocks, n_steps, in_channels):
    layer_out = [in_channels * 2 ** math.floor(n_steps * i / n_blocks)
                 for i in range(n_blocks)]
    ios = [(layer_out[0], layer_out[0])]
    for i in range(1, n_blocks):
        ios.append((layer_out[i - 1], layer_out[i]))
    # make_layer(a, b) = [ConvolutionBlock(a, b), ConvolutionBlock(b, b)]
    blocks = []
    for (cin, cout) in ios:
        blocks.append((cin, cout))
        blocks.append((cout, cout))
    return blocks


def init_model_params(key, block_cfg, in_channels, n_steps):
    """Conv weights in tap-major (3, cout, cin) layout; Linear (1, C_in), (1,)."""
    conv_params = []
    for (a, b) in block_cfg:
        key, k1, k2 = jax.random.split(key, 3)
        bound1 = 1.0 / math.sqrt(a * 3)        # Conv1d kaiming-uniform bound
        w1 = jax.random.uniform(k1, (3, b, a), jnp.float32, -bound1, bound1)
        bound2 = 1.0 / math.sqrt(b * 3)
        w2 = jax.random.uniform(k2, (3, b, b), jnp.float32, -bound2, bound2)
        conv_params.append((w1, w2))

    lin_in = round(in_channels * 2 ** (n_steps - 1))
    key, kw, kb = jax.random.split(key, 3)
    bound = 1.0 / math.sqrt(lin_in)
    lin_w = jax.random.uniform(kw, (1, lin_in), jnp.float32, -bound, bound)
    lin_b = jax.random.uniform(kb, (1,), jnp.float32, -bound, bound)
    return conv_params, (lin_w, lin_b)


# ----------------------------------------------------------------------------
# Wrapper: pack/pad weights once, launch the single fused pallas_call
# ----------------------------------------------------------------------------
def model_forward(x_idx, conv_params, lin_params, block_cfg):
    """x_idx: uint8 index array (L,) with values in [0, 4) -> (L,) f32."""
    L = x_idx.shape[0]
    cmax = max(max(cin, cout) for (cin, cout) in block_cfg)
    C = ((cmax + 7) // 8) * 8                      # pad channels to sublane tile

    # Pack + zero-pad conv weights: (3, cout, cin) -> (C, 3C); column group k
    # multiplies the k-th shifted copy of the activation (x[j-1], x[j], x[j+1]).
    packed = []
    for (w1, w2) in conv_params:
        for w in (w1, w2):
            _, co, ci = w.shape
            wp = jnp.zeros((C, 3 * C), jnp.float32)
            for k in range(3):
                wp = wp.at[:co, k * C:k * C + ci].set(w[k])
            packed.append(wp)
    wconv = jnp.stack(packed)                      # (2*n_blocks, C, 3C)

    lin_w, lin_b = lin_params                      # (1, lin_in), (1,)
    lwp = jnp.zeros((C, 1), jnp.float32).at[:lin_w.shape[1], 0].set(lin_w[0])

    idx = x_idx.astype(jnp.int32).reshape(1, L)

    kernel = functools.partial(fused_forward_kernel,
                               block_cfg=tuple(block_cfg), L=L, C=C)
    out = pl.pallas_call(
        kernel,
        out_shape=jax.ShapeDtypeStruct((1, L), jnp.float32),
        in_specs=[
            pl.BlockSpec(memory_space=pltpu.MemorySpace.VMEM),   # idx
            pl.BlockSpec(memory_space=pltpu.MemorySpace.VMEM),   # conv weights
            pl.BlockSpec(memory_space=pltpu.MemorySpace.VMEM),   # linear weight
            pl.BlockSpec(memory_space=pltpu.MemorySpace.SMEM),   # linear bias
        ],
        out_specs=pl.BlockSpec(memory_space=pltpu.MemorySpace.VMEM),
        scratch_shapes=[pltpu.VMEM((C, L + 2 * LANE), jnp.float32)],
    )(idx, wconv, lwp, lin_b)
    return out[0]                                  # (L,)


# ----------------------------------------------------------------------------
# Pure-JAX reference (for correctness check only)
# ----------------------------------------------------------------------------
def reference_forward(x_idx, conv_params, lin_params, block_cfg):
    hp = jax.lax.Precision.HIGHEST
    x = jax.nn.one_hot(x_idx.astype(jnp.int32), 4, dtype=jnp.float32).T  # (4, L)
    L = x.shape[1]

    def conv(w, v):
        vp = jnp.pad(v, ((0, 0), (1, 1)))
        return sum(jnp.dot(w[k], vp[:, k:k + L], precision=hp) for k in range(3))

    for (w1, w2), (cin, cout) in zip(conv_params, block_cfg):
        h = conv(w1, x)
        y = conv(w2, jnp.maximum(h, 0.0))
        base = x if cin == cout else h
        x = jnp.maximum(base + y, 0.0)

    lin_w, lin_b = lin_params
    z = jnp.dot(lin_w, x, precision=hp)[0] + lin_b[0]
    return jnp.where(z > 20.0, z, jnp.log1p(jnp.exp(jnp.minimum(z, 20.0))))


# ----------------------------------------------------------------------------
if __name__ == "__main__":
    n_blocks, n_steps, in_channels = 4, 2, 4
    L = 256

    key = jax.random.PRNGKey(0)
    key, k_in, k_par = jax.random.split(key, 3)

    x_idx = jax.random.randint(k_in, (L,), 0, 4, dtype=jnp.int32).astype(jnp.uint8)
    block_cfg = model_block_config(n_blocks, n_steps, in_channels)
    conv_params, lin_params = init_model_params(k_par, block_cfg,
                                                in_channels, n_steps)

    out = model_forward(x_idx, conv_params, lin_params, block_cfg)
    out = jax.block_until_ready(out)

    assert out.shape == (L,), out.shape
    assert bool(jnp.all(jnp.isfinite(out))), "non-finite output"

    ref = reference_forward(x_idx, conv_params, lin_params, block_cfg)
    max_err = float(jnp.max(jnp.abs(out - ref)))
    assert max_err < 1e-2, f"kernel/reference mismatch: max_err={max_err}"
    print("KERNEL_OK")
</pallas_src>

<mosaic_0001>
module attributes {stable_mosaic.version = 11 : i64} {
  func.func @fused_forward_kernel(%arg0: memref<1x256xi32, #tpu.memory_space<vmem>>, %arg1: memref<16x8x24xf32, #tpu.memory_space<vmem>>, %arg2: memref<8x1xf32, #tpu.memory_space<vmem>>, %arg3: memref<1xf32, #tpu.memory_space<smem>>, %arg4: memref<1x256xf32, #tpu.memory_space<vmem>>, %arg5: memref<8x512xf32, #tpu.memory_space<vmem>>) attributes {dimension_semantics = [], scalar_prefetch = 0 : i64, scratch_operands = 1 : i64, tpu.core_type = #tpu.core_type<tc>} {
    %cst = arith.constant 0.000000e+00 : f32
    %0 = vector.broadcast %cst : f32 to vector<8x512xf32>
    %c0 = arith.constant 0 : index
    %c0_0 = arith.constant 0 : index
    %1 = vector.load %arg5[%c0, %c0_0] : memref<8x512xf32, #tpu.memory_space<vmem>>, vector<8x512xf32>
    tpu.vector_store %arg5[%c0, %c0_0], %0 {strides = array<i32>} : memref<8x512xf32, #tpu.memory_space<vmem>>, vector<8x512xf32>,
    %2 = tpu.iota {dimensions = array<i32: 0>} : vector<8x256xi32>
    %c0_1 = arith.constant 0 : index
    %c0_2 = arith.constant 0 : index
    %3 = vector.load %arg0[%c0_1, %c0_2] : memref<1x256xi32, #tpu.memory_space<vmem>>, vector<1x256xi32>
    %4 = vector.broadcast %3 : vector<1x256xi32> to vector<8x256xi32>
    %5 = arith.cmpi eq, %2, %4 : vector<8x256xi32>
    %6 = arith.extui %5 : vector<8x256xi1> to vector<8x256xi32>
    %7 = arith.sitofp %6 : vector<8x256xi32> to vector<8x256xf32>
    %c0_3 = arith.constant 0 : index
    %c0_4 = arith.constant 0 : index
    %c0_5 = arith.constant 0 : index
    %8 = vector.load %arg1[%c0_3, %c0_4, %c0_5] : memref<16x8x24xf32, #tpu.memory_space<vmem>>, vector<1x8x24xf32>
    %9 = vector.shape_cast %8 : vector<1x8x24xf32> to vector<8x24xf32>
    %c0_6 = arith.constant 0 : index
    %c128 = arith.constant 128 : index
    %10 = vector.load %arg5[%c0_6, %c128] : memref<8x512xf32, #tpu.memory_space<vmem>>, vector<8x256xf32>
    tpu.vector_store %arg5[%c0_6, %c128], %7 {strides = array<i32>} : memref<8x512xf32, #tpu.memory_space<vmem>>, vector<8x256xf32>,
    %c0_7 = arith.constant 0 : index
    %c127 = arith.constant 127 : index
    %11 = vector.load %arg5[%c0_7, %c127] : memref<8x512xf32, #tpu.memory_space<vmem>>, vector<8x256xf32>
    %c0_8 = arith.constant 0 : index
    %c129 = arith.constant 129 : index
    %12 = vector.load %arg5[%c0_8, %c129] : memref<8x512xf32, #tpu.memory_space<vmem>>, vector<8x256xf32>
    %13 = tpu.concatenate %11, %7, %12 in 0 : vector<8x256xf32>, vector<8x256xf32>, vector<8x256xf32> -> vector<24x256xf32>
    %cst_9 = arith.constant dense<0.000000e+00> : vector<8x256xf32>
    %14 = tpu.matmul %9, %13, %cst_9 {dimension_numbers = #tpu.dot_dimension_numbers<[1], [0], [0], [1], [0, 0, 1, 1], [], []>} : vector<8x24xf32>, vector<24x256xf32>, vector<8x256xf32> -> vector<8x256xf32>
    %c1 = arith.constant 1 : index
    %c0_10 = arith.constant 0 : index
    %c0_11 = arith.constant 0 : index
    %15 = vector.load %arg1[%c1, %c0_10, %c0_11] : memref<16x8x24xf32, #tpu.memory_space<vmem>>, vector<1x8x24xf32>
    %16 = vector.shape_cast %15 : vector<1x8x24xf32> to vector<8x24xf32>
    %cst_12 = arith.constant 0.000000e+00 : f32
    %17 = vector.broadcast %cst_12 : f32 to vector<8x256xf32>
    %18 = arith.maximumf %14, %17 : vector<8x256xf32>
    %c0_13 = arith.constant 0 : index
    %c128_14 = arith.constant 128 : index
    %19 = vector.load %arg5[%c0_13, %c128_14] : memref<8x512xf32, #tpu.memory_space<vmem>>, vector<8x256xf32>
    tpu.vector_store %arg5[%c0_13, %c128_14], %18 {strides = array<i32>} : memref<8x512xf32, #tpu.memory_space<vmem>>, vector<8x256xf32>,
    %c0_15 = arith.constant 0 : index
    %c127_16 = arith.constant 127 : index
    %20 = vector.load %arg5[%c0_15, %c127_16] : memref<8x512xf32, #tpu.memory_space<vmem>>, vector<8x256xf32>
    %c0_17 = arith.constant 0 : index
    %c129_18 = arith.constant 129 : index
    %21 = vector.load %arg5[%c0_17, %c129_18] : memref<8x512xf32, #tpu.memory_space<vmem>>, vector<8x256xf32>
    %22 = tpu.concatenate %20, %18, %21 in 0 : vector<8x256xf32>, vector<8x256xf32>, vector<8x256xf32> -> vector<24x256xf32>
    %cst_19 = arith.constant dense<0.000000e+00> : vector<8x256xf32>
    %23 = tpu.matmul %16, %22, %cst_19 {dimension_numbers = #tpu.dot_dimension_numbers<[1], [0], [0], [1], [0, 0, 1, 1], [], []>} : vector<8x24xf32>, vector<24x256xf32>, vector<8x256xf32> -> vector<8x256xf32>
    %24 = arith.addf %7, %23 : vector<8x256xf32>
    %cst_20 = arith.constant 0.000000e+00 : f32
    %25 = vector.broadcast %cst_20 : f32 to vector<8x256xf32>
    %26 = arith.maximumf %24, %25 : vector<8x256xf32>
    %c2 = arith.constant 2 : index
    %c0_21 = arith.constant 0 : index
    %c0_22 = arith.constant 0 : index
    %27 = vector.load %arg1[%c2, %c0_21, %c0_22] : memref<16x8x24xf32, #tpu.memory_space<vmem>>, vector<1x8x24xf32>
    %28 = vector.shape_cast %27 : vector<1x8x24xf32> to vector<8x24xf32>
    %c0_23 = arith.constant 0 : index
    %c128_24 = arith.constant 128 : index
    %29 = vector.load %arg5[%c0_23, %c128_24] : memref<8x512xf32, #tpu.memory_space<vmem>>, vector<8x256xf32>
    tpu.vector_store %arg5[%c0_23, %c128_24], %26 {strides = array<i32>} : memref<8x512xf32, #tpu.memory_space<vmem>>, vector<8x256xf32>,
    %c0_25 = arith.constant 0 : index
    %c127_26 = arith.constant 127 : index
    %30 = vector.load %arg5[%c0_25, %c127_26] : memref<8x512xf32, #tpu.memory_space<vmem>>, vector<8x256xf32>
    %c0_27 = arith.constant 0 : index
    %c129_28 = arith.constant 129 : index
    %31 = vector.load %arg5[%c0_27, %c129_28] : memref<8x512xf32, #tpu.memory_space<vmem>>, vector<8x256xf32>
    %32 = tpu.concatenate %30, %26, %31 in 0 : vector<8x256xf32>, vector<8x256xf32>, vector<8x256xf32> -> vector<24x256xf32>
    %cst_29 = arith.constant dense<0.000000e+00> : vector<8x256xf32>
    %33 = tpu.matmul %28, %32, %cst_29 {dimension_numbers = #tpu.dot_dimension_numbers<[1], [0], [0], [1], [0, 0, 1, 1], [], []>} : vector<8x24xf32>, vector<24x256xf32>, vector<8x256xf32> -> vector<8x256xf32>
    %c3 = arith.constant 3 : index
    %c0_30 = arith.constant 0 : index
    %c0_31 = arith.constant 0 : index
    %34 = vector.load %arg1[%c3, %c0_30, %c0_31] : memref<16x8x24xf32, #tpu.memory_space<vmem>>, vector<1x8x24xf32>
    %35 = vector.shape_cast %34 : vector<1x8x24xf32> to vector<8x24xf32>
    %cst_32 = arith.constant 0.000000e+00 : f32
    %36 = vector.broadcast %cst_32 : f32 to vector<8x256xf32>
    %37 = arith.maximumf %33, %36 : vector<8x256xf32>
    %c0_33 = arith.constant 0 : index
    %c128_34 = arith.constant 128 : index
    %38 = vector.load %arg5[%c0_33, %c128_34] : memref<8x512xf32, #tpu.memory_space<vmem>>, vector<8x256xf32>
    tpu.vector_store %arg5[%c0_33, %c128_34], %37 {strides = array<i32>} : memref<8x512xf32, #tpu.memory_space<vmem>>, vector<8x256xf32>,
    %c0_35 = arith.constant 0 : index
    %c127_36 = arith.constant 127 : index
    %39 = vector.load %arg5[%c0_35, %c127_36] : memref<8x512xf32, #tpu.memory_space<vmem>>, vector<8x256xf32>
    %c0_37 = arith.constant 0 : index
    %c129_38 = arith.constant 129 : index
    %40 = vector.load %arg5[%c0_37, %c129_38] : memref<8x512xf32, #tpu.memory_space<vmem>>, vector<8x256xf32>
    %41 = tpu.concatenate %39, %37, %40 in 0 : vector<8x256xf32>, vector<8x256xf32>, vector<8x256xf32> -> vector<24x256xf32>
    %cst_39 = arith.constant dense<0.000000e+00> : vector<8x256xf32>
    %42 = tpu.matmul %35, %41, %cst_39 {dimension_numbers = #tpu.dot_dimension_numbers<[1], [0], [0], [1], [0, 0, 1, 1], [], []>} : vector<8x24xf32>, vector<24x256xf32>, vector<8x256xf32> -> vector<8x256xf32>
    %43 = arith.addf %26, %42 : vector<8x256xf32>
    %cst_40 = arith.constant 0.000000e+00 : f32
    %44 = vector.broadcast %cst_40 : f32 to vector<8x256xf32>
    %45 = arith.maximumf %43, %44 : vector<8x256xf32>
    %c4 = arith.constant 4 : index
    %c0_41 = arith.constant 0 : index
    %c0_42 = arith.constant 0 : index
    %46 = vector.load %arg1[%c4, %c0_41, %c0_42] : memref<16x8x24xf32, #tpu.memory_space<vmem>>, vector<1x8x24xf32>
    %47 = vector.shape_cast %46 : vector<1x8x24xf32> to vector<8x24xf32>
    %c0_43 = arith.constant 0 : index
    %c128_44 = arith.constant 128 : index
    %48 = vector.load %arg5[%c0_43, %c128_44] : memref<8x512xf32, #tpu.memory_space<vmem>>, vector<8x256xf32>
    tpu.vector_store %arg5[%c0_43, %c128_44], %45 {strides = array<i32>} : memref<8x512xf32, #tpu.memory_space<vmem>>, vector<8x256xf32>,
    %c0_45 = arith.constant 0 : index
    %c127_46 = arith.constant 127 : index
    %49 = vector.load %arg5[%c0_45, %c127_46] : memref<8x512xf32, #tpu.memory_space<vmem>>, vector<8x256xf32>
    %c0_47 = arith.constant 0 : index
    %c129_48 = arith.constant 129 : index
    %50 = vector.load %arg5[%c0_47, %c129_48] : memref<8x512xf32, #tpu.memory_space<vmem>>, vector<8x256xf32>
    %51 = tpu.concatenate %49, %45, %50 in 0 : vector<8x256xf32>, vector<8x256xf32>, vector<8x256xf32> -> vector<24x256xf32>
    %cst_49 = arith.constant dense<0.000000e+00> : vector<8x256xf32>
    %52 = tpu.matmul %47, %51, %cst_49 {dimension_numbers = #tpu.dot_dimension_numbers<[1], [0], [0], [1], [0, 0, 1, 1], [], []>} : vector<8x24xf32>, vector<24x256xf32>, vector<8x256xf32> -> vector<8x256xf32>
    %c5 = arith.constant 5 : index
    %c0_50 = arith.constant 0 : index
    %c0_51 = arith.constant 0 : index
    %53 = vector.load %arg1[%c5, %c0_50, %c0_51] : memref<16x8x24xf32, #tpu.memory_space<vmem>>, vector<1x8x24xf32>
    %54 = vector.shape_cast %53 : vector<1x8x24xf32> to vector<8x24xf32>
    %cst_52 = arith.constant 0.000000e+00 : f32
    %55 = vector.broadcast %cst_52 : f32 to vector<8x256xf32>
    %56 = arith.maximumf %52, %55 : vector<8x256xf32>
    %c0_53 = arith.constant 0 : index
    %c128_54 = arith.constant 128 : index
    %57 = vector.load %arg5[%c0_53, %c128_54] : memref<8x512xf32, #tpu.memory_space<vmem>>, vector<8x256xf32>
    tpu.vector_store %arg5[%c0_53, %c128_54], %56 {strides = array<i32>} : memref<8x512xf32, #tpu.memory_space<vmem>>, vector<8x256xf32>,
    %c0_55 = arith.constant 0 : index
    %c127_56 = arith.constant 127 : index
    %58 = vector.load %arg5[%c0_55, %c127_56] : memref<8x512xf32, #tpu.memory_space<vmem>>, vector<8x256xf32>
    %c0_57 = arith.constant 0 : index
    %c129_58 = arith.constant 129 : index
    %59 = vector.load %arg5[%c0_57, %c129_58] : memref<8x512xf32, #tpu.memory_space<vmem>>, vector<8x256xf32>
    %60 = tpu.concatenate %58, %56, %59 in 0 : vector<8x256xf32>, vector<8x256xf32>, vector<8x256xf32> -> vector<24x256xf32>
    %cst_59 = arith.constant dense<0.000000e+00> : vector<8x256xf32>
    %61 = tpu.matmul %54, %60, %cst_59 {dimension_numbers = #tpu.dot_dimension_numbers<[1], [0], [0], [1], [0, 0, 1, 1], [], []>} : vector<8x24xf32>, vector<24x256xf32>, vector<8x256xf32> -> vector<8x256xf32>
    %62 = arith.addf %45, %61 : vector<8x256xf32>
    %cst_60 = arith.constant 0.000000e+00 : f32
    %63 = vector.broadcast %cst_60 : f32 to vector<8x256xf32>
    %64 = arith.maximumf %62, %63 : vector<8x256xf32>
    %c6 = arith.constant 6 : index
    %c0_61 = arith.constant 0 : index
    %c0_62 = arith.constant 0 : index
    %65 = vector.load %arg1[%c6, %c0_61, %c0_62] : memref<16x8x24xf32, #tpu.memory_space<vmem>>, vector<1x8x24xf32>
    %66 = vector.shape_cast %65 : vector<1x8x24xf32> to vector<8x24xf32>
    %c0_63 = arith.constant 0 : index
    %c128_64 = arith.constant 128 : index
    %67 = vector.load %arg5[%c0_63, %c128_64] : memref<8x512xf32, #tpu.memory_space<vmem>>, vector<8x256xf32>
    tpu.vector_store %arg5[%c0_63, %c128_64], %64 {strides = array<i32>} : memref<8x512xf32, #tpu.memory_space<vmem>>, vector<8x256xf32>,
    %c0_65 = arith.constant 0 : index
    %c127_66 = arith.constant 127 : index
    %68 = vector.load %arg5[%c0_65, %c127_66] : memref<8x512xf32, #tpu.memory_space<vmem>>, vector<8x256xf32>
    %c0_67 = arith.constant 0 : index
    %c129_68 = arith.constant 129 : index
    %69 = vector.load %arg5[%c0_67, %c129_68] : memref<8x512xf32, #tpu.memory_space<vmem>>, vector<8x256xf32>
    %70 = tpu.concatenate %68, %64, %69 in 0 : vector<8x256xf32>, vector<8x256xf32>, vector<8x256xf32> -> vector<24x256xf32>
    %cst_69 = arith.constant dense<0.000000e+00> : vector<8x256xf32>
    %71 = tpu.matmul %66, %70, %cst_69 {dimension_numbers = #tpu.dot_dimension_numbers<[1], [0], [0], [1], [0, 0, 1, 1], [], []>} : vector<8x24xf32>, vector<24x256xf32>, vector<8x256xf32> -> vector<8x256xf32>
    %c7 = arith.constant 7 : index
    %c0_70 = arith.constant 0 : index
    %c0_71 = arith.constant 0 : index
    %72 = vector.load %arg1[%c7, %c0_70, %c0_71] : memref<16x8x24xf32, #tpu.memory_space<vmem>>, vector<1x8x24xf32>
    %73 = vector.shape_cast %72 : vector<1x8x24xf32> to vector<8x24xf32>
    %cst_72 = arith.constant 0.000000e+00 : f32
    %74 = vector.broadcast %cst_72 : f32 to vector<8x256xf32>
    %75 = arith.maximumf %71, %74 : vector<8x256xf32>
    %c0_73 = arith.constant 0 : index
    %c128_74 = arith.constant 128 : index
    %76 = vector.load %arg5[%c0_73, %c128_74] : memref<8x512xf32, #tpu.memory_space<vmem>>, vector<8x256xf32>
    tpu.vector_store %arg5[%c0_73, %c128_74], %75 {strides = array<i32>} : memref<8x512xf32, #tpu.memory_space<vmem>>, vector<8x256xf32>,
    %c0_75 = arith.constant 0 : index
    %c127_76 = arith.constant 127 : index
    %77 = vector.load %arg5[%c0_75, %c127_76] : memref<8x512xf32, #tpu.memory_space<vmem>>, vector<8x256xf32>
    %c0_77 = arith.constant 0 : index
    %c129_78 = arith.constant 129 : index
    %78 = vector.load %arg5[%c0_77, %c129_78] : memref<8x512xf32, #tpu.memory_space<vmem>>, vector<8x256xf32>
    %79 = tpu.concatenate %77, %75, %78 in 0 : vector<8x256xf32>, vector<8x256xf32>, vector<8x256xf32> -> vector<24x256xf32>
    %cst_79 = arith.constant dense<0.000000e+00> : vector<8x256xf32>
    %80 = tpu.matmul %73, %79, %cst_79 {dimension_numbers = #tpu.dot_dimension_numbers<[1], [0], [0], [1], [0, 0, 1, 1], [], []>} : vector<8x24xf32>, vector<24x256xf32>, vector<8x256xf32> -> vector<8x256xf32>
    %81 = arith.addf %64, %80 : vector<8x256xf32>
    %cst_80 = arith.constant 0.000000e+00 : f32
    %82 = vector.broadcast %cst_80 : f32 to vector<8x256xf32>
    %83 = arith.maximumf %81, %82 : vector<8x256xf32>
    %c8 = arith.constant 8 : index
    %c0_81 = arith.constant 0 : index
    %c0_82 = arith.constant 0 : index
    %84 = vector.load %arg1[%c8, %c0_81, %c0_82] : memref<16x8x24xf32, #tpu.memory_space<vmem>>, vector<1x8x24xf32>
    %85 = vector.shape_cast %84 : vector<1x8x24xf32> to vector<8x24xf32>
    %c0_83 = arith.constant 0 : index
    %c128_84 = arith.constant 128 : index
    %86 = vector.load %arg5[%c0_83, %c128_84] : memref<8x512xf32, #tpu.memory_space<vmem>>, vector<8x256xf32>
    tpu.vector_store %arg5[%c0_83, %c128_84], %83 {strides = array<i32>} : memref<8x512xf32, #tpu.memory_space<vmem>>, vector<8x256xf32>,
    %c0_85 = arith.constant 0 : index
    %c127_86 = arith.constant 127 : index
    %87 = vector.load %arg5[%c0_85, %c127_86] : memref<8x512xf32, #tpu.memory_space<vmem>>, vector<8x256xf32>
    %c0_87 = arith.constant 0 : index
    %c129_88 = arith.constant 129 : index
    %88 = vector.load %arg5[%c0_87, %c129_88] : memref<8x512xf32, #tpu.memory_space<vmem>>, vector<8x256xf32>
    %89 = tpu.concatenate %87, %83, %88 in 0 : vector<8x256xf32>, vector<8x256xf32>, vector<8x256xf32> -> vector<24x256xf32>
    %cst_89 = arith.constant dense<0.000000e+00> : vector<8x256xf32>
    %90 = tpu.matmul %85, %89, %cst_89 {dimension_numbers = #tpu.dot_dimension_numbers<[1], [0], [0], [1], [0, 0, 1, 1], [], []>} : vector<8x24xf32>, vector<24x256xf32>, vector<8x256xf32> -> vector<8x256xf32>
    %c9 = arith.constant 9 : index
    %c0_90 = arith.constant 0 : index
    %c0_91 = arith.constant 0 : index
    %91 = vector.load %arg1[%c9, %c0_90, %c0_91] : memref<16x8x24xf32, #tpu.memory_space<vmem>>, vector<1x8x24xf32>
    %92 = vector.shape_cast %91 : vector<1x8x24xf32> to vector<8x24xf32>
    %cst_92 = arith.constant 0.000000e+00 : f32
    %93 = vector.broadcast %cst_92 : f32 to vector<8x256xf32>
    %94 = arith.maximumf %90, %93 : vector<8x256xf32>
    %c0_93 = arith.constant 0 : index
    %c128_94 = arith.constant 128 : index
    %95 = vector.load %arg5[%c0_93, %c128_94] : memref<8x512xf32, #tpu.memory_space<vmem>>, vector<8x256xf32>
    tpu.vector_store %arg5[%c0_93, %c128_94], %94 {strides = array<i32>} : memref<8x512xf32, #tpu.memory_space<vmem>>, vector<8x256xf32>,
    %c0_95 = arith.constant 0 : index
    %c127_96 = arith.constant 127 : index
    %96 = vector.load %arg5[%c0_95, %c127_96] : memref<8x512xf32, #tpu.memory_space<vmem>>, vector<8x256xf32>
    %c0_97 = arith.constant 0 : index
    %c129_98 = arith.constant 129 : index
    %97 = vector.load %arg5[%c0_97, %c129_98] : memref<8x512xf32, #tpu.memory_space<vmem>>, vector<8x256xf32>
    %98 = tpu.concatenate %96, %94, %97 in 0 : vector<8x256xf32>, vector<8x256xf32>, vector<8x256xf32> -> vector<24x256xf32>
    %cst_99 = arith.constant dense<0.000000e+00> : vector<8x256xf32>
    %99 = tpu.matmul %92, %98, %cst_99 {dimension_numbers = #tpu.dot_dimension_numbers<[1], [0], [0], [1], [0, 0, 1, 1], [], []>} : vector<8x24xf32>, vector<24x256xf32>, vector<8x256xf32> -> vector<8x256xf32>
    %100 = arith.addf %90, %99 : vector<8x256xf32>
    %cst_100 = arith.constant 0.000000e+00 : f32
    %101 = vector.broadcast %cst_100 : f32 to vector<8x256xf32>
    %102 = arith.maximumf %100, %101 : vector<8x256xf32>
    %c10 = arith.constant 10 : index
    %c0_101 = arith.constant 0 : index
    %c0_102 = arith.constant 0 : index
    %103 = vector.load %arg1[%c10, %c0_101, %c0_102] : memref<16x8x24xf32, #tpu.memory_space<vmem>>, vector<1x8x24xf32>
    %104 = vector.shape_cast %103 : vector<1x8x24xf32> to vector<8x24xf32>
    %c0_103 = arith.constant 0 : index
    %c128_104 = arith.constant 128 : index
    %105 = vector.load %arg5[%c0_103, %c128_104] : memref<8x512xf32, #tpu.memory_space<vmem>>, vector<8x256xf32>
    tpu.vector_store %arg5[%c0_103, %c128_104], %102 {strides = array<i32>} : memref<8x512xf32, #tpu.memory_space<vmem>>, vector<8x256xf32>,
    %c0_105 = arith.constant 0 : index
    %c127_106 = arith.constant 127 : index
    %106 = vector.load %arg5[%c0_105, %c127_106] : memref<8x512xf32, #tpu.memory_space<vmem>>, vector<8x256xf32>
    %c0_107 = arith.constant 0 : index
    %c129_108 = arith.constant 129 : index
    %107 = vector.load %arg5[%c0_107, %c129_108] : memref<8x512xf32, #tpu.memory_space<vmem>>, vector<8x256xf32>
    %108 = tpu.concatenate %106, %102, %107 in 0 : vector<8x256xf32>, vector<8x256xf32>, vector<8x256xf32> -> vector<24x256xf32>
    %cst_109 = arith.constant dense<0.000000e+00> : vector<8x256xf32>
    %109 = tpu.matmul %104, %108, %cst_109 {dimension_numbers = #tpu.dot_dimension_numbers<[1], [0], [0], [1], [0, 0, 1, 1], [], []>} : vector<8x24xf32>, vector<24x256xf32>, vector<8x256xf32> -> vector<8x256xf32>
    %c11 = arith.constant 11 : index
    %c0_110 = arith.constant 0 : index
    %c0_111 = arith.constant 0 : index
    %110 = vector.load %arg1[%c11, %c0_110, %c0_111] : memref<16x8x24xf32, #tpu.memory_space<vmem>>, vector<1x8x24xf32>
    %111 = vector.shape_cast %110 : vector<1x8x24xf32> to vector<8x24xf32>
    %cst_112 = arith.constant 0.000000e+00 : f32
    %112 = vector.broadcast %cst_112 : f32 to vector<8x256xf32>
    %113 = arith.maximumf %109, %112 : vector<8x256xf32>
    %c0_113 = arith.constant 0 : index
    %c128_114 = arith.constant 128 : index
    %114 = vector.load %arg5[%c0_113, %c128_114] : memref<8x512xf32, #tpu.memory_space<vmem>>, vector<8x256xf32>
    tpu.vector_store %arg5[%c0_113, %c128_114], %113 {strides = array<i32>} : memref<8x512xf32, #tpu.memory_space<vmem>>, vector<8x256xf32>,
    %c0_115 = arith.constant 0 : index
    %c127_116 = arith.constant 127 : index
    %115 = vector.load %arg5[%c0_115, %c127_116] : memref<8x512xf32, #tpu.memory_space<vmem>>, vector<8x256xf32>
    %c0_117 = arith.constant 0 : index
    %c129_118 = arith.constant 129 : index
    %116 = vector.load %arg5[%c0_117, %c129_118] : memref<8x512xf32, #tpu.memory_space<vmem>>, vector<8x256xf32>
    %117 = tpu.concatenate %115, %113, %116 in 0 : vector<8x256xf32>, vector<8x256xf32>, vector<8x256xf32> -> vector<24x256xf32>
    %cst_119 = arith.constant dense<0.000000e+00> : vector<8x256xf32>
    %118 = tpu.matmul %111, %117, %cst_119 {dimension_numbers = #tpu.dot_dimension_numbers<[1], [0], [0], [1], [0, 0, 1, 1], [], []>} : vector<8x24xf32>, vector<24x256xf32>, vector<8x256xf32> -> vector<8x256xf32>
    %119 = arith.addf %102, %118 : vector<8x256xf32>
    %cst_120 = arith.constant 0.000000e+00 : f32
    %120 = vector.broadcast %cst_120 : f32 to vector<8x256xf32>
    %121 = arith.maximumf %119, %120 : vector<8x256xf32>
    %c12 = arith.constant 12 : index
    %c0_121 = arith.constant 0 : index
    %c0_122 = arith.constant 0 : index
    %122 = vector.load %arg1[%c12, %c0_121, %c0_122] : memref<16x8x24xf32, #tpu.memory_space<vmem>>, vector<1x8x24xf32>
    %123 = vector.shape_cast %122 : vector<1x8x24xf32> to vector<8x24xf32>
    %c0_123 = arith.constant 0 : index
    %c128_124 = arith.constant 128 : index
    %124 = vector.load %arg5[%c0_123, %c128_124] : memref<8x512xf32, #tpu.memory_space<vmem>>, vector<8x256xf32>
    tpu.vector_store %arg5[%c0_123, %c128_124], %121 {strides = array<i32>} : memref<8x512xf32, #tpu.memory_space<vmem>>, vector<8x256xf32>,
    %c0_125 = arith.constant 0 : index
    %c127_126 = arith.constant 127 : index
    %125 = vector.load %arg5[%c0_125, %c127_126] : memref<8x512xf32, #tpu.memory_space<vmem>>, vector<8x256xf32>
    %c0_127 = arith.constant 0 : index
    %c129_128 = arith.constant 129 : index
    %126 = vector.load %arg5[%c0_127, %c129_128] : memref<8x512xf32, #tpu.memory_space<vmem>>, vector<8x256xf32>
    %127 = tpu.concatenate %125, %121, %126 in 0 : vector<8x256xf32>, vector<8x256xf32>, vector<8x256xf32> -> vector<24x256xf32>
    %cst_129 = arith.constant dense<0.000000e+00> : vector<8x256xf32>
    %128 = tpu.matmul %123, %127, %cst_129 {dimension_numbers = #tpu.dot_dimension_numbers<[1], [0], [0], [1], [0, 0, 1, 1], [], []>} : vector<8x24xf32>, vector<24x256xf32>, vector<8x256xf32> -> vector<8x256xf32>
    %c13 = arith.constant 13 : index
    %c0_130 = arith.constant 0 : index
    %c0_131 = arith.constant 0 : index
    %129 = vector.load %arg1[%c13, %c0_130, %c0_131] : memref<16x8x24xf32, #tpu.memory_space<vmem>>, vector<1x8x24xf32>
    %130 = vector.shape_cast %129 : vector<1x8x24xf32> to vector<8x24xf32>
    %cst_132 = arith.constant 0.000000e+00 : f32
    %131 = vector.broadcast %cst_132 : f32 to vector<8x256xf32>
    %132 = arith.maximumf %128, %131 : vector<8x256xf32>
    %c0_133 = arith.constant 0 : index
    %c128_134 = arith.constant 128 : index
    %133 = vector.load %arg5[%c0_133, %c128_134] : memref<8x512xf32, #tpu.memory_space<vmem>>, vector<8x256xf32>
    tpu.vector_store %arg5[%c0_133, %c128_134], %132 {strides = array<i32>} : memref<8x512xf32, #tpu.memory_space<vmem>>, vector<8x256xf32>,
    %c0_135 = arith.constant 0 : index
    %c127_136 = arith.constant 127 : index
    %134 = vector.load %arg5[%c0_135, %c127_136] : memref<8x512xf32, #tpu.memory_space<vmem>>, vector<8x256xf32>
    %c0_137 = arith.constant 0 : index
    %c129_138 = arith.constant 129 : index
    %135 = vector.load %arg5[%c0_137, %c129_138] : memref<8x512xf32, #tpu.memory_space<vmem>>, vector<8x256xf32>
    %136 = tpu.concatenate %134, %132, %135 in 0 : vector<8x256xf32>, vector<8x256xf32>, vector<8x256xf32> -> vector<24x256xf32>
    %cst_139 = arith.constant dense<0.000000e+00> : vector<8x256xf32>
    %137 = tpu.matmul %130, %136, %cst_139 {dimension_numbers = #tpu.dot_dimension_numbers<[1], [0], [0], [1], [0, 0, 1, 1], [], []>} : vector<8x24xf32>, vector<24x256xf32>, vector<8x256xf32> -> vector<8x256xf32>
    %138 = arith.addf %121, %137 : vector<8x256xf32>
    %cst_140 = arith.constant 0.000000e+00 : f32
    %139 = vector.broadcast %cst_140 : f32 to vector<8x256xf32>
    %140 = arith.maximumf %138, %139 : vector<8x256xf32>
    %c14 = arith.constant 14 : index
    %c0_141 = arith.constant 0 : index
    %c0_142 = arith.constant 0 : index
    %141 = vector.load %arg1[%c14, %c0_141, %c0_142] : memref<16x8x24xf32, #tpu.memory_space<vmem>>, vector<1x8x24xf32>
    %142 = vector.shape_cast %141 : vector<1x8x24xf32> to vector<8x24xf32>
    %c0_143 = arith.constant 0 : index
    %c128_144 = arith.constant 128 : index
    %143 = vector.load %arg5[%c0_143, %c128_144] : memref<8x512xf32, #tpu.memory_space<vmem>>, vector<8x256xf32>
    tpu.vector_store %arg5[%c0_143, %c128_144], %140 {strides = array<i32>} : memref<8x512xf32, #tpu.memory_space<vmem>>, vector<8x256xf32>,
    %c0_145 = arith.constant 0 : index
    %c127_146 = arith.constant 127 : index
    %144 = vector.load %arg5[%c0_145, %c127_146] : memref<8x512xf32, #tpu.memory_space<vmem>>, vector<8x256xf32>
    %c0_147 = arith.constant 0 : index
    %c129_148 = arith.constant 129 : index
    %145 = vector.load %arg5[%c0_147, %c129_148] : memref<8x512xf32, #tpu.memory_space<vmem>>, vector<8x256xf32>
    %146 = tpu.concatenate %144, %140, %145 in 0 : vector<8x256xf32>, vector<8x256xf32>, vector<8x256xf32> -> vector<24x256xf32>
    %cst_149 = arith.constant dense<0.000000e+00> : vector<8x256xf32>
    %147 = tpu.matmul %142, %146, %cst_149 {dimension_numbers = #tpu.dot_dimension_numbers<[1], [0], [0], [1], [0, 0, 1, 1], [], []>} : vector<8x24xf32>, vector<24x256xf32>, vector<8x256xf32> -> vector<8x256xf32>
    %c15 = arith.constant 15 : index
    %c0_150 = arith.constant 0 : index
    %c0_151 = arith.constant 0 : index
    %148 = vector.load %arg1[%c15, %c0_150, %c0_151] : memref<16x8x24xf32, #tpu.memory_space<vmem>>, vector<1x8x24xf32>
    %149 = vector.shape_cast %148 : vector<1x8x24xf32> to vector<8x24xf32>
    %cst_152 = arith.constant 0.000000e+00 : f32
    %150 = vector.broadcast %cst_152 : f32 to vector<8x256xf32>
    %151 = arith.maximumf %147, %150 : vector<8x256xf32>
    %c0_153 = arith.constant 0 : index
    %c128_154 = arith.constant 128 : index
    %152 = vector.load %arg5[%c0_153, %c128_154] : memref<8x512xf32, #tpu.memory_space<vmem>>, vector<8x256xf32>
    tpu.vector_store %arg5[%c0_153, %c128_154], %151 {strides = array<i32>} : memref<8x512xf32, #tpu.memory_space<vmem>>, vector<8x256xf32>,
    %c0_155 = arith.constant 0 : index
    %c127_156 = arith.constant 127 : index
    %153 = vector.load %arg5[%c0_155, %c127_156] : memref<8x512xf32, #tpu.memory_space<vmem>>, vector<8x256xf32>
    %c0_157 = arith.constant 0 : index
    %c129_158 = arith.constant 129 : index
    %154 = vector.load %arg5[%c0_157, %c129_158] : memref<8x512xf32, #tpu.memory_space<vmem>>, vector<8x256xf32>
    %155 = tpu.concatenate %153, %151, %154 in 0 : vector<8x256xf32>, vector<8x256xf32>, vector<8x256xf32> -> vector<24x256xf32>
    %cst_159 = arith.constant dense<0.000000e+00> : vector<8x256xf32>
    %156 = tpu.matmul %149, %155, %cst_159 {dimension_numbers = #tpu.dot_dimension_numbers<[1], [0], [0], [1], [0, 0, 1, 1], [], []>} : vector<8x24xf32>, vector<24x256xf32>, vector<8x256xf32> -> vector<8x256xf32>
    %157 = arith.addf %140, %156 : vector<8x256xf32>
    %cst_160 = arith.constant 0.000000e+00 : f32
    %158 = vector.broadcast %cst_160 : f32 to vector<8x256xf32>
    %159 = arith.maximumf %157, %158 : vector<8x256xf32>
    %c0_161 = arith.constant 0 : index
    %c0_162 = arith.constant 0 : index
    %160 = vector.load %arg2[%c0_161, %c0_162] : memref<8x1xf32, #tpu.memory_space<vmem>>, vector<8x1xf32>
    %161 = vector.broadcast %160 : vector<8x1xf32> to vector<8x256xf32>
    %162 = arith.mulf %161, %159 : vector<8x256xf32>
    %cst_163 = arith.constant dense<0.000000e+00> : vector<256xf32>
    %163 = vector.multi_reduction <add>, %162, %cst_163 [0] : vector<8x256xf32> to vector<256xf32>
    %164 = vector.shape_cast %163 : vector<256xf32> to vector<1x256xf32>
    %c0_164 = arith.constant 0 : index
    %165 = memref.load %arg3[%c0_164] : memref<1xf32, #tpu.memory_space<smem>>
    %166 = vector.broadcast %165 : f32 to vector<1x256xf32>
    %167 = arith.addf %164, %166 : vector<1x256xf32>
    %cst_165 = arith.constant 2.000000e+01 : f32
    %168 = vector.broadcast %cst_165 : f32 to vector<1x256xf32>
    %169 = arith.cmpf ogt, %167, %168 : vector<1x256xf32>
    %cst_166 = arith.constant 2.000000e+01 : f32
    %170 = vector.broadcast %cst_166 : f32 to vector<1x256xf32>
    %171 = arith.minimumf %167, %170 : vector<1x256xf32>
    %172 = math.exp %171 : vector<1x256xf32>
    %173 = math.log1p %172 : vector<1x256xf32>
    %174 = arith.select %169, %167, %173 : vector<1x256xi1>, vector<1x256xf32>
    %c0_167 = arith.constant 0 : index
    %c0_168 = arith.constant 0 : index
    %175 = vector.load %arg4[%c0_167, %c0_168] : memref<1x256xf32, #tpu.memory_space<vmem>>, vector<1x256xf32>
    tpu.vector_store %arg4[%c0_167, %c0_168], %174 {strides = array<i32>} : memref<1x256xf32, #tpu.memory_space<vmem>>, vector<1x256xf32>,
    return
  }
}

</mosaic_0001>

<bundles_post_ra>
// kernel: tpu_custom_call.1
= control target key start
LH: loop header
LB: loop body
LE: loop exit
PB: predicated region body
PF: predicated region fallthrough
CT: control target
= control target key end

     0   :  { %10 = vsyncpa [#allocation5], 0  ;;  %s3033_s0 = inlined_call_operand.vmem [shape: s32[1,256], index: 0, kind: input, shape index: {}]   ;;  %s3034_s1 = inlined_call_operand.hbm [shape: f32[16,8,24], index: 1, kind: input, shape index: {}]   ;;  %s3035_s2 = inlined_call_operand.vmem [shape: f32[8,1], index: 2, kind: input, shape index: {}]   ;;  %s3036_s3 = inlined_call_operand.<no memory space> [shape: f32[1], index: 3, kind: input, shape index: {}]   ;;  %s3037_s4 = inlined_call_operand.hbm [shape: f32[1,256], index: 4, kind: output, shape index: {}]  }
   0x1   :  { %11 = vsyncpa [#allocation6], 0  ;;  %s2466_s15 = smov [#allocation4]  }
   0x2   :  { %s19_s16 = sshll.u32 %s2466_s15, 4  ;;  %s20_s16 = int_to_ptr.vmem [resolvable:$true] %s19_s16 }
   0x3   :  { %s2430_s17 = scalar_lea.vmem %s20_s16, 2048  ;;  %p2435_p1 = scmp.lt.s32.totalorder %s20_s16, %s20_s16 }
   0x4   :  { %p2431_p0 = scmp.ne.s32.totalorder %s20_s16, %s2430_s17  ;;  %p2436_p2 = scmp.lt.s32.totalorder %s2430_s17, %s2430_s17 }
   0x6   :  { %p2437_p3 = por %p2436_p2, %p2435_p1 }
   0x8   :  { %p2438_p4 = pnand %p2437_p3, %p2431_p0 }
   0xa   :  { %2441 = shalt.err (!%p2438_p4)
}
   0xb   :  { %s2467_s18 = smov 128   ;;  %s2468_s19 = smov 8  }
   0xc   :  { %25 = dma.hbm_to_vmem [thread:$0]  %s3034_s1, 2048, %s20_s16, [#allocation5], %s2467_s18, %s2467_s18, %s2468_s19  }
   0xd   :  { %2462 = dma.done.wait [#allocation5], 2048  }
   0xe   :  { %2463 = vsyncadd [#allocation5], 4294965248  ;;  %v37_v0 = vlaneseq  ;;  %v2469_v1 = vmov 0.0   ;;  %v39_v5 = vld [vmem:[%s3033_s0] sm:$0x3]  ;;  %s2470_s1 = smov 127  }
   0xf   :  { %185 = vmatprep.mubr.f32.mxu0 %v2469_v1  ;;  %322 = vmatprep.mubr.f32.mxu1 %v2469_v1  ;;  %s2471_s24 = smov 126   ;;  %vm69_vm2 = vcmask 1039360   ;;  %vm80_vm3 = vcmask 1031168   ;;  %s2472_s0 = smov 1   ;;  %vm104_vm4 = vcmask 7168   ;;  %v54_v43 = vld [vmem:[#allocation4] sm:$0xff] }
  0x10   :  { %v2507_v2 = vshrl.u32 %v37_v0, 7  ;;  %vm117_vm5 = vcmask 195584   ;;  %vm2337_vm10 = vcmp.lt.s32.totalorder %v37_v0, 256 }
  0x12   :  { %v42_v3 = vsub.s32 0, %v2507_v2  ;;  %v46_v4 = vsub.s32 1, %v2507_v2 }
  0x14   :  { %v43_v6 = vrot.slane %v39_v5, %v42_v3  ;;  %v47_v7 = vrot.slane %v39_v5, %v46_v4 }
  0x16   :  { %vm48_vm0 = vcmp.eq.s32.totalorder %v2507_v2, %v43_v6  ;;  %vm49_vm1 = vcmp.eq.s32.totalorder %v2507_v2, %v47_v7 }
  0x17   :  { %v2517_v8 = vsel %vm48_vm0, 1.0, %v2469_v1  ;;  %v2520_v9 = vsel %vm49_vm1, 1.0, %v2469_v1 }
  0x18   :  { %v2388_v10 = vpack.i.bf16 %v2520_v9, %v2517_v8 }
  0x1a   :  { %2389 = vrot.lane.b32.xlu1 %v2388_v10, %s2470_s1  ;;  %2384 = vrot.lane.b32.xlu0 %v2388_v10, %s2471_s24 }
  0x1e   :  { %78 = vrot.lane.b32.xlu0 %v2469_v1, %s2471_s24 }
  0x8c   :  { %v2390_v11 = vpop.permute.xlu1 %2389  ;;  %v2385_v12 = vpop.permute.xlu0 %2384 }
  0x8d   :  { %v2392_v13 = vunpack.i.h.bf16 %v2390_v11  ;;  %v2391_v14 = vunpack.i.l.bf16 %v2390_v11  ;;  %v2387_v15 = vunpack.i.h.bf16 %v2385_v12  ;;  %v2386_v16 = vunpack.i.l.bf16 %v2385_v12  ;;  %v193_v11 = vld [vmem:[#allocation4 + $0x8] sm:$0xff] }
  0x8f   :  { %v70_v17 = vsel %vm69_vm2, %v2391_v14, %v2392_v13  ;;  %v81_v20 = vsel %vm80_vm3, %v2386_v16, %v2387_v15  ;;  %v2398_v23 = vpack.i.bf16 %v2391_v14, %v2392_v13 }
  0x90   :  { %v79_v18 = vpop.permute.xlu0 %78  ;;  %v2403_v19 = vpack.i.bf16 %v70_v17, %v2386_v16 }
  0x91   :  { %v82_v21 = vsel %vm80_vm3, %v2387_v15, %v79_v18 }
  0x92   :  { %v2393_v22 = vpack.i.bf16 %v82_v21, %v81_v20  ;;  %2404 = vrot.lane.b32.xlu0 %v2403_v19, %s2472_s0 }
  0x94   :  { %2394 = vrot.lane.b32.xlu1 %v2393_v22, %s2472_s0 }
  0x96   :  { %2409 = vrot.lane.b32.xlu0 %v2388_v10, %s2472_s0 }
  0x98   :  { %2399 = vrot.lane.b32.xlu1 %v2398_v23, %s2472_s0 }
  0x9a   :  { %218 = vrot.lane.b32.xlu0 %v2469_v1, %s2471_s24 }
  0x9c   :  { %86 = vrot.lane.b32.xlu1 %v2469_v1, %s2472_s0 }
 0x104   :  { %v2405_v24 = vpop.permute.xlu0 %2404 }
 0x105   :  { %v2406_v26 = vunpack.i.l.bf16 %v2405_v24  ;;  %v2407_v35 = vunpack.i.h.bf16 %v2405_v24 }
 0x106   :  { %v2395_v25 = vpop.permute.xlu1 %2394 }
 0x107   :  { %v2397_v27 = vunpack.i.h.bf16 %v2395_v25  ;;  %v2396_v28 = vunpack.i.l.bf16 %v2395_v25 }
 0x108   :  { %v2410_v29 = vpop.permute.xlu0 %2409 }
 0x109   :  { %v110_v30 = vsel %vm104_vm4, %v2396_v28, %v2397_v27  ;;  %v109_v31 = vsel %vm104_vm4, %v2406_v26, %v2396_v28  ;;  %v2412_v32 = vunpack.i.h.bf16 %v2410_v29  ;;  %v2411_v33 = vunpack.i.l.bf16 %v2410_v29 }
 0x10a   :  { %v2400_v34 = vpop.permute.xlu1 %2399  ;;  %147 = vmatprep.subr.mxu0 %v110_v30 }
 0x10b   :  { %v2402_v36 = vunpack.i.h.bf16 %v2400_v34  ;;  %v2401_v37 = vunpack.i.l.bf16 %v2400_v34  ;;  %148 = vmatpush1.msra.mxu0 %v109_v31  ;;  %v106_v40 = vsel %vm104_vm4, %v2411_v33, %v2412_v32 }
 0x10c   :  { %v219_v48 = vpop.permute.xlu0 %218 }
 0x10d   :  { %v108_v38 = vsel %vm104_vm4, %v2407_v35, %v2401_v37  ;;  %v107_v39 = vsel %vm104_vm4, %v2402_v36, %v2407_v35 }
 0x10e   :  { %v87_v41 = vpop.permute.xlu1 %86  ;;  %149 = vmatprep.subr.mxu0 %v108_v38 }
 0x10f   :  { %150 = vmatpush1.msra.mxu0 %v107_v39  ;;  %v105_v42 = vsel %vm104_vm4, %v87_v41, %v2411_v33  ;;  %v334_v39 = vld [vmem:[#allocation4 + $0x10] sm:$0xff] }
 0x110   :  { %151 = vmatprep.subr.mxu0 %v106_v40 }
 0x111   :  { %152 = vmatpush1.msra.mxu0 %v105_v42 }
 0x112   :  { %2357 = vmatmul.mubr.msk.f32.vlgmr.msra.gmra.mxu0 %vm117_vm5, %v54_v43 }
 0x113   :  { %461 = vmatprep.mubr.f32.mxu0 %v2469_v1 }
 0x1d2   :  { %v187_v44 = vpop.f32.mrf.mxu0 }
 0x1d3   :  { %v194_v45 = vmax.f32 %v187_v44, 0.0 }
 0x1d4   :  { %v189_v46 = vpop.f32.mrf.mxu0 }
 0x1d5   :  { %v195_v47 = vmax.f32 %v189_v46, 0.0  ;;  %214 = vrot.lane.b32.xlu0 %v194_v45, %s2471_s24 }
 0x1d7   :  { %216 = vrot.lane.b32.xlu1 %v195_v47, %s2471_s24 }
 0x1d9   :  { %208 = vrot.lane.b32.xlu0 %v195_v47, %s2470_s1 }
 0x1db   :  { %206 = vrot.lane.b32.xlu1 %v194_v45, %s2470_s1 }
 0x247   :  { %v215_v49 = vpop.permute.xlu0 %214 }
 0x248   :  { %237 = vrot.lane.b32.xlu1 %v215_v49, %s2472_s0 }
 0x249   :  { %v217_v50 = vpop.permute.xlu1 %216 }
 0x24a   :  { %v220_v53 = vsel %vm80_vm3, %v215_v49, %v217_v50  ;;  %v221_v54 = vsel %vm80_vm3, %v217_v50, %v219_v48 }
 0x24b   :  { %v209_v51 = vpop.permute.xlu0 %208 }
 0x24c   :  { %235 = vrot.lane.b32.xlu1 %v209_v51, %s2472_s0 }
 0x24d   :  { %v207_v52 = vpop.permute.xlu1 %206 }
 0x24e   :  { %231 = vrot.lane.b32.xlu0 %v207_v52, %s2472_s0  ;;  %v210_v55 = vsel %vm69_vm2, %v207_v52, %v209_v51 }
 0x250   :  { %239 = vrot.lane.b32.xlu1 %v220_v53, %s2472_s0 }
 0x252   :  { %241 = vrot.lane.b32.xlu0 %v221_v54, %s2472_s0 }
 0x254   :  { %227 = vrot.lane.b32.xlu1 %v194_v45, %s2472_s0 }
 0x256   :  { %233 = vrot.lane.b32.xlu0 %v210_v55, %s2472_s0 }
 0x258   :  { %225 = vrot.lane.b32.xlu1 %v2469_v1, %s2472_s0 }
 0x25a   :  { %229 = vrot.lane.b32.xlu0 %v195_v47, %s2472_s0 }
 0x25e   :  { %357 = vrot.lane.b32.xlu0 %v2469_v1, %s2471_s24 }
 0x2ba   :  { %v238_v56 = vpop.permute.xlu1 %237 }
 0x2be   :  { %v236_v57 = vpop.permute.xlu1 %235 }
 0x2c0   :  { %v232_v58 = vpop.permute.xlu0 %231 }
 0x2c2   :  { %v240_v59 = vpop.permute.xlu1 %239 }
 0x2c3   :  { %v247_v63 = vsel %vm104_vm4, %v238_v56, %v240_v59 }
 0x2c4   :  { %v242_v60 = vpop.permute.xlu0 %241 }
 0x2c5   :  { %v248_v61 = vsel %vm104_vm4, %v240_v59, %v242_v60 }
 0x2c6   :  { %284 = vmatprep.subr.mxu1 %v248_v61  ;;  %v228_v62 = vpop.permute.xlu1 %227 }
 0x2c7   :  { %285 = vmatpush1.msra.mxu1 %v247_v63 }
 0x2c8   :  { %v234_v3 = vpop.permute.xlu0 %233 }
 0x2c9   :  { %v246_v4 = vsel %vm104_vm4, %v234_v3, %v236_v57  ;;  %v245_v5 = vsel %vm104_vm4, %v232_v58, %v234_v3 }
 0x2ca   :  { %286 = vmatprep.subr.mxu1 %v246_v4  ;;  %v226_v6 = vpop.permute.xlu1 %225 }
 0x2cb   :  { %287 = vmatpush1.msra.mxu1 %v245_v5  ;;  %v243_v12 = vsel %vm104_vm4, %v226_v6, %v228_v62  ;;  %v469_v6 = vld [vmem:[#allocation4 + $0x18] sm:$0xff] }
 0x2cc   :  { %v230_v7 = vpop.permute.xlu0 %229 }
 0x2cd   :  { %v244_v10 = vsel %vm104_vm4, %v228_v62, %v230_v7 }
 0x2ce   :  { %288 = vmatprep.subr.mxu1 %v244_v10 }
 0x2cf   :  { %289 = vmatpush1.msra.mxu1 %v243_v12 }
 0x2d0   :  { %2358 = vmatmul.mubr.msk.f32.vlgmr.msra.gmra.mxu1 %vm117_vm5, %v193_v11 }
 0x2d1   :  { %598 = vmatprep.mubr.f32.mxu1 %v2469_v1 }
 0x390   :  { %v324_v13 = vpop.f32.mrf.mxu1 }
 0x391   :  { %v329_v14 = vadd.f32 %v2517_v8, %v324_v13  ;;  %v358_v8 = vpop.permute.xlu0 %357 }
 0x392   :  { %v326_v15 = vpop.f32.mrf.mxu1 }
 0x393   :  { %v2575_v16 = vmax.f32 %v329_v14, 0.0  ;;  %v330_v17 = vadd.f32 %v2520_v9, %v326_v15 }
 0x395   :  { %v2578_v18 = vmax.f32 %v330_v17, 0.0  ;;  %353 = vrot.lane.b32.xlu0 %v2575_v16, %s2471_s24 }
 0x397   :  { %355 = vrot.lane.b32.xlu1 %v2578_v18, %s2471_s24 }
 0x399   :  { %347 = vrot.lane.b32.xlu0 %v2578_v18, %s2470_s1 }
 0x39b   :  { %345 = vrot.lane.b32.xlu1 %v2575_v16, %s2470_s1 }
 0x407   :  { %v354_v19 = vpop.permute.xlu0 %353 }
 0x408   :  { %376 = vrot.lane.b32.xlu1 %v354_v19, %s2472_s0 }
 0x409   :  { %v356_v20 = vpop.permute.xlu1 %355 }
 0x40a   :  { %v359_v22 = vsel %vm80_vm3, %v354_v19, %v356_v20  ;;  %v360_v23 = vsel %vm80_vm3, %v356_v20, %v358_v8 }
 0x40b   :  { %v348_v9 = vpop.permute.xlu0 %347 }
 0x40c   :  { %374 = vrot.lane.b32.xlu1 %v348_v9, %s2472_s0 }
 0x40d   :  { %v346_v21 = vpop.permute.xlu1 %345 }
 0x40e   :  { %370 = vrot.lane.b32.xlu0 %v346_v21, %s2472_s0  ;;  %v349_v24 = vsel %vm69_vm2, %v346_v21, %v348_v9 }
 0x410   :  { %378 = vrot.lane.b32.xlu1 %v359_v22, %s2472_s0 }
 0x412   :  { %380 = vrot.lane.b32.xlu0 %v360_v23, %s2472_s0 }
 0x414   :  { %366 = vrot.lane.b32.xlu1 %v2575_v16, %s2472_s0 }
 0x416   :  { %372 = vrot.lane.b32.xlu0 %v349_v24, %s2472_s0 }
 0x418   :  { %364 = vrot.lane.b32.xlu1 %v2469_v1, %s2472_s0 }
 0x41a   :  { %368 = vrot.lane.b32.xlu0 %v2578_v18, %s2472_s0 }
 0x41e   :  { %494 = vrot.lane.b32.xlu0 %v2469_v1, %s2471_s24 }
 0x47a   :  { %v377_v25 = vpop.permute.xlu1 %376 }
 0x47e   :  { %v375_v26 = vpop.permute.xlu1 %374 }
 0x480   :  { %v371_v27 = vpop.permute.xlu0 %370 }
 0x482   :  { %v379_v28 = vpop.permute.xlu1 %378 }
 0x483   :  { %v386_v32 = vsel %vm104_vm4, %v377_v25, %v379_v28 }
 0x484   :  { %v381_v29 = vpop.permute.xlu0 %380 }
 0x485   :  { %v387_v30 = vsel %vm104_vm4, %v379_v28, %v381_v29 }
 0x486   :  { %423 = vmatprep.subr.mxu0 %v387_v30  ;;  %v367_v31 = vpop.permute.xlu1 %366 }
 0x487   :  { %424 = vmatpush1.msra.mxu0 %v386_v32 }
 0x488   :  { %v373_v33 = vpop.permute.xlu0 %372 }
 0x489   :  { %v385_v34 = vsel %vm104_vm4, %v373_v33, %v375_v26  ;;  %v384_v35 = vsel %vm104_vm4, %v371_v27, %v373_v33 }
 0x48a   :  { %425 = vmatprep.subr.mxu0 %v385_v34  ;;  %v365_v36 = vpop.permute.xlu1 %364 }
 0x48b   :  { %426 = vmatpush1.msra.mxu0 %v384_v35  ;;  %v382_v40 = vsel %vm104_vm4, %v365_v36, %v367_v31  ;;  %v610_v36 = vld [vmem:[#allocation4 + $0x20] sm:$0xff] }
 0x48c   :  { %v369_v37 = vpop.permute.xlu0 %368 }
 0x48d   :  { %v383_v38 = vsel %vm104_vm4, %v367_v31, %v369_v37 }
 0x48e   :  { %427 = vmatprep.subr.mxu0 %v383_v38 }
 0x48f   :  { %428 = vmatpush1.msra.mxu0 %v382_v40 }
 0x490   :  { %2359 = vmatmul.mubr.msk.f32.vlgmr.msra.gmra.mxu0 %vm117_vm5, %v334_v39  ;;  %v495_v45 = vpop.permute.xlu0 %494 }
 0x491   :  { %737 = vmatprep.mubr.f32.mxu0 %v2469_v1 }
 0x550   :  { %v463_v41 = vpop.f32.mrf.mxu0 }
 0x551   :  { %v470_v42 = vmax.f32 %v463_v41, 0.0 }
 0x552   :  { %v465_v43 = vpop.f32.mrf.mxu0 }
 0x553   :  { %v471_v44 = vmax.f32 %v465_v43, 0.0  ;;  %490 = vrot.lane.b32.xlu0 %v470_v42, %s2471_s24 }
 0x555   :  { %492 = vrot.lane.b32.xlu1 %v471_v44, %s2471_s24 }
 0x557   :  { %484 = vrot.lane.b32.xlu0 %v471_v44, %s2470_s1 }
 0x559   :  { %482 = vrot.lane.b32.xlu1 %v470_v42, %s2470_s1 }
 0x5c5   :  { %v491_v46 = vpop.permute.xlu0 %490 }
 0x5c6   :  { %513 = vrot.lane.b32.xlu1 %v491_v46, %s2472_s0 }
 0x5c7   :  { %v493_v47 = vpop.permute.xlu1 %492 }
 0x5c8   :  { %v496_v50 = vsel %vm80_vm3, %v491_v46, %v493_v47  ;;  %v497_v51 = vsel %vm80_vm3, %v493_v47, %v495_v45 }
 0x5c9   :  { %v485_v48 = vpop.permute.xlu0 %484 }
 0x5ca   :  { %511 = vrot.lane.b32.xlu1 %v485_v48, %s2472_s0 }
 0x5cb   :  { %v483_v49 = vpop.permute.xlu1 %482 }
 0x5cc   :  { %507 = vrot.lane.b32.xlu0 %v483_v49, %s2472_s0  ;;  %v486_v52 = vsel %vm69_vm2, %v483_v49, %v485_v48 }
 0x5ce   :  { %515 = vrot.lane.b32.xlu1 %v496_v50, %s2472_s0 }
 0x5d0   :  { %517 = vrot.lane.b32.xlu0 %v497_v51, %s2472_s0 }
 0x5d2   :  { %503 = vrot.lane.b32.xlu1 %v470_v42, %s2472_s0 }
 0x5d4   :  { %509 = vrot.lane.b32.xlu0 %v486_v52, %s2472_s0 }
 0x5d6   :  { %501 = vrot.lane.b32.xlu1 %v2469_v1, %s2472_s0 }
 0x5d8   :  { %505 = vrot.lane.b32.xlu0 %v471_v44, %s2472_s0 }
 0x5dc   :  { %633 = vrot.lane.b32.xlu0 %v2469_v1, %s2471_s24 }
 0x638   :  { %v514_v53 = vpop.permute.xlu1 %513 }
 0x63c   :  { %v512_v54 = vpop.permute.xlu1 %511 }
 0x63e   :  { %v508_v55 = vpop.permute.xlu0 %507 }
 0x640   :  { %v516_v56 = vpop.permute.xlu1 %515 }
 0x641   :  { %v523_v60 = vsel %vm104_vm4, %v514_v53, %v516_v56 }
 0x642   :  { %v518_v57 = vpop.permute.xlu0 %517 }
 0x643   :  { %v524_v58 = vsel %vm104_vm4, %v516_v56, %v518_v57 }
 0x644   :  { %560 = vmatprep.subr.mxu1 %v524_v58  ;;  %v504_v59 = vpop.permute.xlu1 %503 }
 0x645   :  { %561 = vmatpush1.msra.mxu1 %v523_v60 }
 0x646   :  { %v510_v61 = vpop.permute.xlu0 %509 }
 0x647   :  { %v522_v62 = vsel %vm104_vm4, %v510_v61, %v512_v54  ;;  %v521_v63 = vsel %vm104_vm4, %v508_v55, %v510_v61 }
 0x648   :  { %562 = vmatprep.subr.mxu1 %v522_v62  ;;  %v502_v3 = vpop.permute.xlu1 %501 }
 0x649   :  { %563 = vmatpush1.msra.mxu1 %v521_v63  ;;  %v519_v7 = vsel %vm104_vm4, %v502_v3, %v504_v59  ;;  %v745_v3 = vld [vmem:[#allocation4 + $0x28] sm:$0xff] }
 0x64a   :  { %v506_v4 = vpop.permute.xlu0 %505 }
 0x64b   :  { %v520_v5 = vsel %vm104_vm4, %v504_v59, %v506_v4 }
 0x64c   :  { %564 = vmatprep.subr.mxu1 %v520_v5 }
 0x64d   :  { %565 = vmatpush1.msra.mxu1 %v519_v7 }
 0x64e   :  { %2360 = vmatmul.mubr.msk.f32.vlgmr.msra.gmra.mxu1 %vm117_vm5, %v469_v6 }
 0x64f   :  { %874 = vmatprep.mubr.f32.mxu1 %v2469_v1 }
 0x70e   :  { %v600_v10 = vpop.f32.mrf.mxu1 }
 0x70f   :  { %v605_v11 = vadd.f32 %v600_v10, %v2575_v16  ;;  %v634_v16 = vpop.permute.xlu0 %633 }
 0x710   :  { %v602_v12 = vpop.f32.mrf.mxu1 }
 0x711   :  { %v2641_v13 = vmax.f32 %v605_v11, 0.0  ;;  %v606_v14 = vadd.f32 %v602_v12, %v2578_v18 }
 0x713   :  { %v2644_v15 = vmax.f32 %v606_v14, 0.0  ;;  %629 = vrot.lane.b32.xlu0 %v2641_v13, %s2471_s24 }
 0x715   :  { %631 = vrot.lane.b32.xlu1 %v2644_v15, %s2471_s24 }
 0x717   :  { %623 = vrot.lane.b32.xlu0 %v2644_v15, %s2470_s1 }
 0x719   :  { %621 = vrot.lane.b32.xlu1 %v2641_v13, %s2470_s1 }
 0x785   :  { %v630_v17 = vpop.permute.xlu0 %629 }
 0x786   :  { %652 = vrot.lane.b32.xlu1 %v630_v17, %s2472_s0 }
 0x787   :  { %v632_v8 = vpop.permute.xlu1 %631 }
 0x788   :  { %v635_v20 = vsel %vm80_vm3, %v630_v17, %v632_v8  ;;  %v636_v9 = vsel %vm80_vm3, %v632_v8, %v634_v16 }
 0x789   :  { %v624_v18 = vpop.permute.xlu0 %623 }
 0x78a   :  { %650 = vrot.lane.b32.xlu1 %v624_v18, %s2472_s0 }
 0x78b   :  { %v622_v19 = vpop.permute.xlu1 %621 }
 0x78c   :  { %646 = vrot.lane.b32.xlu0 %v622_v19, %s2472_s0  ;;  %v625_v21 = vsel %vm69_vm2, %v622_v19, %v624_v18 }
 0x78e   :  { %654 = vrot.lane.b32.xlu1 %v635_v20, %s2472_s0 }
 0x790   :  { %656 = vrot.lane.b32.xlu0 %v636_v9, %s2472_s0 }
 0x792   :  { %642 = vrot.lane.b32.xlu1 %v2641_v13, %s2472_s0 }
 0x794   :  { %648 = vrot.lane.b32.xlu0 %v625_v21, %s2472_s0 }
 0x796   :  { %640 = vrot.lane.b32.xlu1 %v2469_v1, %s2472_s0 }
 0x798   :  { %644 = vrot.lane.b32.xlu0 %v2644_v15, %s2472_s0 }
 0x79c   :  { %770 = vrot.lane.b32.xlu0 %v2469_v1, %s2471_s24 }
 0x7f8   :  { %v653_v22 = vpop.permute.xlu1 %652 }
 0x7fc   :  { %v651_v23 = vpop.permute.xlu1 %650 }
 0x7fe   :  { %v647_v24 = vpop.permute.xlu0 %646 }
 0x800   :  { %v655_v25 = vpop.permute.xlu1 %654 }
 0x801   :  { %v662_v29 = vsel %vm104_vm4, %v653_v22, %v655_v25 }
 0x802   :  { %v657_v26 = vpop.permute.xlu0 %656 }
 0x803   :  { %v663_v27 = vsel %vm104_vm4, %v655_v25, %v657_v26 }
 0x804   :  { %699 = vmatprep.subr.mxu0 %v663_v27  ;;  %v643_v28 = vpop.permute.xlu1 %642 }
 0x805   :  { %700 = vmatpush1.msra.mxu0 %v662_v29 }
 0x806   :  { %v649_v30 = vpop.permute.xlu0 %648 }
 0x807   :  { %v661_v31 = vsel %vm104_vm4, %v649_v30, %v651_v23  ;;  %v660_v32 = vsel %vm104_vm4, %v647_v24, %v649_v30 }
 0x808   :  { %701 = vmatprep.subr.mxu0 %v661_v31  ;;  %v641_v33 = vpop.permute.xlu1 %640 }
 0x809   :  { %702 = vmatpush1.msra.mxu0 %v660_v32  ;;  %v658_v37 = vsel %vm104_vm4, %v641_v33, %v643_v28  ;;  %v886_v33 = vld [vmem:[#allocation4 + $0x30] sm:$0xff] }
 0x80a   :  { %v645_v34 = vpop.permute.xlu0 %644 }
 0x80b   :  { %v659_v35 = vsel %vm104_vm4, %v643_v28, %v645_v34 }
 0x80c   :  { %703 = vmatprep.subr.mxu0 %v659_v35 }
 0x80d   :  { %704 = vmatpush1.msra.mxu0 %v658_v37 }
 0x80e   :  { %2361 = vmatmul.mubr.msk.f32.vlgmr.msra.gmra.mxu0 %vm117_vm5, %v610_v36  ;;  %v771_v42 = vpop.permute.xlu0 %770 }
 0x80f   :  { %1013 = vmatprep.mubr.f32.mxu0 %v2469_v1 }
 0x8ce   :  { %v739_v38 = vpop.f32.mrf.mxu0 }
 0x8cf   :  { %v746_v39 = vmax.f32 %v739_v38, 0.0 }
 0x8d0   :  { %v741_v40 = vpop.f32.mrf.mxu0 }
 0x8d1   :  { %v747_v41 = vmax.f32 %v741_v40, 0.0  ;;  %766 = vrot.lane.b32.xlu0 %v746_v39, %s2471_s24 }
 0x8d3   :  { %768 = vrot.lane.b32.xlu1 %v747_v41, %s2471_s24 }
 0x8d5   :  { %760 = vrot.lane.b32.xlu0 %v747_v41, %s2470_s1 }
 0x8d7   :  { %758 = vrot.lane.b32.xlu1 %v746_v39, %s2470_s1 }
 0x943   :  { %v767_v43 = vpop.permute.xlu0 %766 }
 0x944   :  { %789 = vrot.lane.b32.xlu1 %v767_v43, %s2472_s0 }
 0x945   :  { %v769_v44 = vpop.permute.xlu1 %768 }
 0x946   :  { %v772_v47 = vsel %vm80_vm3, %v767_v43, %v769_v44  ;;  %v773_v48 = vsel %vm80_vm3, %v769_v44, %v771_v42 }
 0x947   :  { %v761_v45 = vpop.permute.xlu0 %760 }
 0x948   :  { %787 = vrot.lane.b32.xlu1 %v761_v45, %s2472_s0 }
 0x949   :  { %v759_v46 = vpop.permute.xlu1 %758 }
 0x94a   :  { %783 = vrot.lane.b32.xlu0 %v759_v46, %s2472_s0  ;;  %v762_v49 = vsel %vm69_vm2, %v759_v46, %v761_v45 }
 0x94c   :  { %791 = vrot.lane.b32.xlu1 %v772_v47, %s2472_s0 }
 0x94e   :  { %793 = vrot.lane.b32.xlu0 %v773_v48, %s2472_s0 }
 0x950   :  { %779 = vrot.lane.b32.xlu1 %v746_v39, %s2472_s0 }
 0x952   :  { %785 = vrot.lane.b32.xlu0 %v762_v49, %s2472_s0 }
 0x954   :  { %777 = vrot.lane.b32.xlu1 %v2469_v1, %s2472_s0 }
 0x956   :  { %781 = vrot.lane.b32.xlu0 %v747_v41, %s2472_s0 }
 0x95a   :  { %909 = vrot.lane.b32.xlu0 %v2469_v1, %s2471_s24 }
 0x9b6   :  { %v790_v50 = vpop.permute.xlu1 %789 }
 0x9ba   :  { %v788_v51 = vpop.permute.xlu1 %787 }
 0x9bc   :  { %v784_v52 = vpop.permute.xlu0 %783 }
 0x9be   :  { %v792_v53 = vpop.permute.xlu1 %791 }
 0x9bf   :  { %v799_v57 = vsel %vm104_vm4, %v790_v50, %v792_v53 }
 0x9c0   :  { %v794_v54 = vpop.permute.xlu0 %793 }
 0x9c1   :  { %v800_v55 = vsel %vm104_vm4, %v792_v53, %v794_v54 }
 0x9c2   :  { %836 = vmatprep.subr.mxu1 %v800_v55  ;;  %v780_v56 = vpop.permute.xlu1 %779 }
 0x9c3   :  { %837 = vmatpush1.msra.mxu1 %v799_v57 }
 0x9c4   :  { %v786_v58 = vpop.permute.xlu0 %785 }
 0x9c5   :  { %v798_v59 = vsel %vm104_vm4, %v786_v58, %v788_v51  ;;  %v797_v60 = vsel %vm104_vm4, %v784_v52, %v786_v58 }
 0x9c6   :  { %838 = vmatprep.subr.mxu1 %v798_v59  ;;  %v778_v61 = vpop.permute.xlu1 %777 }
 0x9c7   :  { %839 = vmatpush1.msra.mxu1 %v797_v60  ;;  %v795_v4 = vsel %vm104_vm4, %v778_v61, %v780_v56  ;;  %v1021_v61 = vld [vmem:[#allocation4 + $0x38] sm:$0xff] }
 0x9c8   :  { %v782_v62 = vpop.permute.xlu0 %781 }
 0x9c9   :  { %v796_v63 = vsel %vm104_vm4, %v780_v56, %v782_v62 }
 0x9ca   :  { %840 = vmatprep.subr.mxu1 %v796_v63 }
 0x9cb   :  { %841 = vmatpush1.msra.mxu1 %v795_v4 }
 0x9cc   :  { %2362 = vmatmul.mubr.msk.f32.vlgmr.msra.gmra.mxu1 %vm117_vm5, %v745_v3 }
 0x9cd   :  { %1150 = vmatprep.mubr.f32.mxu1 %v2469_v1 }
 0xa8c   :  { %v876_v5 = vpop.f32.mrf.mxu1 }
 0xa8d   :  { %v881_v6 = vadd.f32 %v876_v5, %v2641_v13  ;;  %v910_v13 = vpop.permute.xlu0 %909 }
 0xa8e   :  { %v878_v7 = vpop.f32.mrf.mxu1 }
 0xa8f   :  { %v2707_v10 = vmax.f32 %v881_v6, 0.0  ;;  %v882_v11 = vadd.f32 %v878_v7, %v2644_v15 }
 0xa91   :  { %v2710_v12 = vmax.f32 %v882_v11, 0.0  ;;  %905 = vrot.lane.b32.xlu0 %v2707_v10, %s2471_s24 }
 0xa93   :  { %907 = vrot.lane.b32.xlu1 %v2710_v12, %s2471_s24 }
 0xa95   :  { %899 = vrot.lane.b32.xlu0 %v2710_v12, %s2470_s1 }
 0xa97   :  { %897 = vrot.lane.b32.xlu1 %v2707_v10, %s2470_s1 }
 0xb03   :  { %v906_v14 = vpop.permute.xlu0 %905 }
 0xb04   :  { %928 = vrot.lane.b32.xlu1 %v906_v14, %s2472_s0 }
 0xb05   :  { %v908_v16 = vpop.permute.xlu1 %907 }
 0xb06   :  { %v911_v8 = vsel %vm80_vm3, %v906_v14, %v908_v16  ;;  %v912_v18 = vsel %vm80_vm3, %v908_v16, %v910_v13 }
 0xb07   :  { %v900_v15 = vpop.permute.xlu0 %899 }
 0xb08   :  { %926 = vrot.lane.b32.xlu1 %v900_v15, %s2472_s0 }
 0xb09   :  { %v898_v17 = vpop.permute.xlu1 %897 }
 0xb0a   :  { %922 = vrot.lane.b32.xlu0 %v898_v17, %s2472_s0  ;;  %v901_v19 = vsel %vm69_vm2, %v898_v17, %v900_v15 }
 0xb0c   :  { %930 = vrot.lane.b32.xlu1 %v911_v8, %s2472_s0 }
 0xb0e   :  { %932 = vrot.lane.b32.xlu0 %v912_v18, %s2472_s0 }
 0xb10   :  { %918 = vrot.lane.b32.xlu1 %v2707_v10, %s2472_s0 }
 0xb12   :  { %924 = vrot.lane.b32.xlu0 %v901_v19, %s2472_s0 }
 0xb14   :  { %916 = vrot.lane.b32.xlu1 %v2469_v1, %s2472_s0 }
 0xb16   :  { %920 = vrot.lane.b32.xlu0 %v2710_v12, %s2472_s0 }
 0xb1a   :  { %1046 = vrot.lane.b32.xlu0 %v2469_v1, %s2471_s24 }
 0xb76   :  { %v929_v20 = vpop.permute.xlu1 %928 }
 0xb7a   :  { %v927_v9 = vpop.permute.xlu1 %926 }
 0xb7c   :  { %v923_v21 = vpop.permute.xlu0 %922 }
 0xb7e   :  { %v931_v22 = vpop.permute.xlu1 %930 }
 0xb7f   :  { %v938_v26 = vsel %vm104_vm4, %v929_v20, %v931_v22 }
 0xb80   :  { %v933_v23 = vpop.permute.xlu0 %932 }
 0xb81   :  { %v939_v24 = vsel %vm104_vm4, %v931_v22, %v933_v23 }
 0xb82   :  { %975 = vmatprep.subr.mxu0 %v939_v24  ;;  %v919_v25 = vpop.permute.xlu1 %918 }
 0xb83   :  { %976 = vmatpush1.msra.mxu0 %v938_v26 }
 0xb84   :  { %v925_v27 = vpop.permute.xlu0 %924 }
 0xb85   :  { %v937_v28 = vsel %vm104_vm4, %v925_v27, %v927_v9  ;;  %v936_v29 = vsel %vm104_vm4, %v923_v21, %v925_v27 }
 0xb86   :  { %977 = vmatprep.subr.mxu0 %v937_v28  ;;  %v917_v30 = vpop.permute.xlu1 %916 }
 0xb87   :  { %978 = vmatpush1.msra.mxu0 %v936_v29  ;;  %v934_v34 = vsel %vm104_vm4, %v917_v30, %v919_v25  ;;  %v1162_v30 = vld [vmem:[#allocation4 + $0x40] sm:$0xff] }
 0xb88   :  { %v921_v31 = vpop.permute.xlu0 %920 }
 0xb89   :  { %v935_v32 = vsel %vm104_vm4, %v919_v25, %v921_v31 }
 0xb8a   :  { %979 = vmatprep.subr.mxu0 %v935_v32 }
 0xb8b   :  { %980 = vmatpush1.msra.mxu0 %v934_v34 }
 0xb8c   :  { %2363 = vmatmul.mubr.msk.f32.vlgmr.msra.gmra.mxu0 %vm117_vm5, %v886_v33  ;;  %v1047_v39 = vpop.permute.xlu0 %1046 }
 0xb8d   :  { %1289 = vmatprep.mubr.f32.mxu0 %v2469_v1 }
 0xc4c   :  { %v1015_v35 = vpop.f32.mrf.mxu0 }
 0xc4d   :  { %v1022_v36 = vmax.f32 %v1015_v35, 0.0 }
 0xc4e   :  { %v1017_v37 = vpop.f32.mrf.mxu0 }
 0xc4f   :  { %v1023_v38 = vmax.f32 %v1017_v37, 0.0  ;;  %1042 = vrot.lane.b32.xlu0 %v1022_v36, %s2471_s24 }
 0xc51   :  { %1044 = vrot.lane.b32.xlu1 %v1023_v38, %s2471_s24 }
 0xc53   :  { %1036 = vrot.lane.b32.xlu0 %v1023_v38, %s2470_s1 }
 0xc55   :  { %1034 = vrot.lane.b32.xlu1 %v1022_v36, %s2470_s1 }
 0xcc1   :  { %v1043_v40 = vpop.permute.xlu0 %1042 }
 0xcc2   :  { %1065 = vrot.lane.b32.xlu1 %v1043_v40, %s2472_s0 }
 0xcc3   :  { %v1045_v41 = vpop.permute.xlu1 %1044 }
 0xcc4   :  { %v1048_v44 = vsel %vm80_vm3, %v1043_v40, %v1045_v41  ;;  %v1049_v45 = vsel %vm80_vm3, %v1045_v41, %v1047_v39 }
 0xcc5   :  { %v1037_v42 = vpop.permute.xlu0 %1036 }
 0xcc6   :  { %1063 = vrot.lane.b32.xlu1 %v1037_v42, %s2472_s0 }
 0xcc7   :  { %v1035_v43 = vpop.permute.xlu1 %1034 }
 0xcc8   :  { %1059 = vrot.lane.b32.xlu0 %v1035_v43, %s2472_s0  ;;  %v1038_v46 = vsel %vm69_vm2, %v1035_v43, %v1037_v42 }
 0xcca   :  { %1067 = vrot.lane.b32.xlu1 %v1048_v44, %s2472_s0 }
 0xccc   :  { %1069 = vrot.lane.b32.xlu0 %v1049_v45, %s2472_s0 }
 0xcce   :  { %1055 = vrot.lane.b32.xlu1 %v1022_v36, %s2472_s0 }
 0xcd0   :  { %1061 = vrot.lane.b32.xlu0 %v1038_v46, %s2472_s0 }
 0xcd2   :  { %1053 = vrot.lane.b32.xlu1 %v2469_v1, %s2472_s0 }
 0xcd4   :  { %1057 = vrot.lane.b32.xlu0 %v1023_v38, %s2472_s0 }
 0xcd8   :  { %1185 = vrot.lane.b32.xlu0 %v2469_v1, %s2471_s24 }
 0xd34   :  { %v1066_v47 = vpop.permute.xlu1 %1065 }
 0xd38   :  { %v1064_v48 = vpop.permute.xlu1 %1063 }
 0xd3a   :  { %v1060_v49 = vpop.permute.xlu0 %1059 }
 0xd3c   :  { %v1068_v50 = vpop.permute.xlu1 %1067 }
 0xd3d   :  { %v1075_v54 = vsel %vm104_vm4, %v1066_v47, %v1068_v50 }
 0xd3e   :  { %v1070_v51 = vpop.permute.xlu0 %1069 }
 0xd3f   :  { %v1076_v52 = vsel %vm104_vm4, %v1068_v50, %v1070_v51 }
 0xd40   :  { %1112 = vmatprep.subr.mxu1 %v1076_v52  ;;  %v1056_v53 = vpop.permute.xlu1 %1055 }
 0xd41   :  { %1113 = vmatpush1.msra.mxu1 %v1075_v54 }
 0xd42   :  { %v1062_v55 = vpop.permute.xlu0 %1061 }
 0xd43   :  { %v1074_v56 = vsel %vm104_vm4, %v1062_v55, %v1064_v48  ;;  %v1073_v57 = vsel %vm104_vm4, %v1060_v49, %v1062_v55 }
 0xd44   :  { %1114 = vmatprep.subr.mxu1 %v1074_v56  ;;  %v1054_v58 = vpop.permute.xlu1 %1053 }
 0xd45   :  { %1115 = vmatpush1.msra.mxu1 %v1073_v57  ;;  %v1071_v62 = vsel %vm104_vm4, %v1054_v58, %v1056_v53  ;;  %v1297_v58 = vld [vmem:[#allocation4 + $0x48] sm:$0xff] }
 0xd46   :  { %v1058_v59 = vpop.permute.xlu0 %1057 }
 0xd47   :  { %v1072_v60 = vsel %vm104_vm4, %v1056_v53, %v1058_v59 }
 0xd48   :  { %1116 = vmatprep.subr.mxu1 %v1072_v60 }
 0xd49   :  { %1117 = vmatpush1.msra.mxu1 %v1071_v62 }
 0xd4a   :  { %2364 = vmatmul.mubr.msk.f32.vlgmr.msra.gmra.mxu1 %vm117_vm5, %v1021_v61  ;;  %v1186_v11 = vpop.permute.xlu0 %1185 }
 0xd4b   :  { %1426 = vmatprep.mubr.f32.mxu1 %v2469_v1 }
 0xe0a   :  { %v1152_v63 = vpop.f32.mrf.mxu1 }
 0xe0b   :  { %v1157_v3 = vadd.f32 %v1152_v63, %v2707_v10 }
 0xe0c   :  { %v1154_v4 = vpop.f32.mrf.mxu1 }
 0xe0d   :  { %v1159_v5 = vmax.f32 %v1157_v3, 0.0  ;;  %v1158_v6 = vadd.f32 %v1154_v4, %v2710_v12 }
 0xe0f   :  { %v1160_v7 = vmax.f32 %v1158_v6, 0.0  ;;  %1181 = vrot.lane.b32.xlu0 %v1159_v5, %s2471_s24 }
 0xe11   :  { %1183 = vrot.lane.b32.xlu1 %v1160_v7, %s2471_s24 }
 0xe13   :  { %1175 = vrot.lane.b32.xlu0 %v1160_v7, %s2470_s1 }
 0xe15   :  { %1173 = vrot.lane.b32.xlu1 %v1159_v5, %s2470_s1 }
 0xe81   :  { %v1182_v13 = vpop.permute.xlu0 %1181 }
 0xe82   :  { %1204 = vrot.lane.b32.xlu1 %v1182_v13, %s2472_s0 }
 0xe83   :  { %v1184_v14 = vpop.permute.xlu1 %1183 }
 0xe84   :  { %v1187_v12 = vsel %vm80_vm3, %v1182_v13, %v1184_v14  ;;  %v1188_v15 = vsel %vm80_vm3, %v1184_v14, %v1186_v11 }
 0xe85   :  { %v1176_v16 = vpop.permute.xlu0 %1175 }
 0xe86   :  { %1202 = vrot.lane.b32.xlu1 %v1176_v16, %s2472_s0 }
 0xe87   :  { %v1174_v10 = vpop.permute.xlu1 %1173 }
 0xe88   :  { %1198 = vrot.lane.b32.xlu0 %v1174_v10, %s2472_s0  ;;  %v1177_v17 = vsel %vm69_vm2, %v1174_v10, %v1176_v16 }
 0xe8a   :  { %1206 = vrot.lane.b32.xlu1 %v1187_v12, %s2472_s0 }
 0xe8c   :  { %1208 = vrot.lane.b32.xlu0 %v1188_v15, %s2472_s0 }
 0xe8e   :  { %1194 = vrot.lane.b32.xlu1 %v1159_v5, %s2472_s0 }
 0xe90   :  { %1200 = vrot.lane.b32.xlu0 %v1177_v17, %s2472_s0 }
 0xe92   :  { %1192 = vrot.lane.b32.xlu1 %v2469_v1, %s2472_s0 }
 0xe94   :  { %1196 = vrot.lane.b32.xlu0 %v1160_v7, %s2472_s0 }
 0xe98   :  { %1322 = vrot.lane.b32.xlu0 %v2469_v1, %s2471_s24 }
 0xef4   :  { %v1205_v8 = vpop.permute.xlu1 %1204 }
 0xef8   :  { %v1203_v18 = vpop.permute.xlu1 %1202 }
 0xefa   :  { %v1199_v19 = vpop.permute.xlu0 %1198 }
 0xefc   :  { %v1207_v20 = vpop.permute.xlu1 %1206 }
 0xefd   :  { %v1214_v23 = vsel %vm104_vm4, %v1205_v8, %v1207_v20 }
 0xefe   :  { %v1209_v9 = vpop.permute.xlu0 %1208 }
 0xeff   :  { %v1215_v21 = vsel %vm104_vm4, %v1207_v20, %v1209_v9 }
 0xf00   :  { %1251 = vmatprep.subr.mxu0 %v1215_v21  ;;  %v1195_v22 = vpop.permute.xlu1 %1194 }
 0xf01   :  { %1252 = vmatpush1.msra.mxu0 %v1214_v23 }
 0xf02   :  { %v1201_v24 = vpop.permute.xlu0 %1200 }
 0xf03   :  { %v1213_v25 = vsel %vm104_vm4, %v1201_v24, %v1203_v18  ;;  %v1212_v26 = vsel %vm104_vm4, %v1199_v19, %v1201_v24 }
 0xf04   :  { %1253 = vmatprep.subr.mxu0 %v1213_v25  ;;  %v1193_v27 = vpop.permute.xlu1 %1192 }
 0xf05   :  { %1254 = vmatpush1.msra.mxu0 %v1212_v26  ;;  %v1210_v31 = vsel %vm104_vm4, %v1193_v27, %v1195_v22  ;;  %v1438_v27 = vld [vmem:[#allocation4 + $0x50] sm:$0xff] }
 0xf06   :  { %v1197_v28 = vpop.permute.xlu0 %1196 }
 0xf07   :  { %v1211_v29 = vsel %vm104_vm4, %v1195_v22, %v1197_v28 }
 0xf08   :  { %1255 = vmatprep.subr.mxu0 %v1211_v29 }
 0xf09   :  { %1256 = vmatpush1.msra.mxu0 %v1210_v31 }
 0xf0a   :  { %2365 = vmatmul.mubr.msk.f32.vlgmr.msra.gmra.mxu0 %vm117_vm5, %v1162_v30  ;;  %v1323_v36 = vpop.permute.xlu0 %1322 }
 0xf0b   :  { %1565 = vmatprep.mubr.f32.mxu0 %v2469_v1 }
 0xfca   :  { %v1291_v32 = vpop.f32.mrf.mxu0 }
 0xfcb   :  { %v1298_v33 = vmax.f32 %v1291_v32, 0.0 }
 0xfcc   :  { %v1293_v34 = vpop.f32.mrf.mxu0 }
 0xfcd   :  { %v1299_v35 = vmax.f32 %v1293_v34, 0.0  ;;  %1318 = vrot.lane.b32.xlu0 %v1298_v33, %s2471_s24 }
 0xfcf   :  { %1320 = vrot.lane.b32.xlu1 %v1299_v35, %s2471_s24 }
 0xfd1   :  { %1312 = vrot.lane.b32.xlu0 %v1299_v35, %s2470_s1 }
 0xfd3   :  { %1310 = vrot.lane.b32.xlu1 %v1298_v33, %s2470_s1 }
0x103f   :  { %v1319_v37 = vpop.permute.xlu0 %1318 }
0x1040   :  { %1341 = vrot.lane.b32.xlu1 %v1319_v37, %s2472_s0 }
0x1041   :  { %v1321_v38 = vpop.permute.xlu1 %1320 }
0x1042   :  { %v1324_v41 = vsel %vm80_vm3, %v1319_v37, %v1321_v38  ;;  %v1325_v42 = vsel %vm80_vm3, %v1321_v38, %v1323_v36 }
0x1043   :  { %v1313_v39 = vpop.permute.xlu0 %1312 }
0x1044   :  { %1339 = vrot.lane.b32.xlu1 %v1313_v39, %s2472_s0 }
0x1045   :  { %v1311_v40 = vpop.permute.xlu1 %1310 }
0x1046   :  { %1335 = vrot.lane.b32.xlu0 %v1311_v40, %s2472_s0  ;;  %v1314_v43 = vsel %vm69_vm2, %v1311_v40, %v1313_v39 }
0x1048   :  { %1343 = vrot.lane.b32.xlu1 %v1324_v41, %s2472_s0 }
0x104a   :  { %1345 = vrot.lane.b32.xlu0 %v1325_v42, %s2472_s0 }
0x104c   :  { %1331 = vrot.lane.b32.xlu1 %v1298_v33, %s2472_s0 }
0x104e   :  { %1337 = vrot.lane.b32.xlu0 %v1314_v43, %s2472_s0 }
0x1050   :  { %1329 = vrot.lane.b32.xlu1 %v2469_v1, %s2472_s0 }
0x1052   :  { %1333 = vrot.lane.b32.xlu0 %v1299_v35, %s2472_s0 }
0x1056   :  { %1461 = vrot.lane.b32.xlu0 %v2469_v1, %s2471_s24 }
0x10b2   :  { %v1342_v44 = vpop.permute.xlu1 %1341 }
0x10b6   :  { %v1340_v45 = vpop.permute.xlu1 %1339 }
0x10b8   :  { %v1336_v46 = vpop.permute.xlu0 %1335 }
0x10ba   :  { %v1344_v47 = vpop.permute.xlu1 %1343 }
0x10bb   :  { %v1351_v50 = vsel %vm104_vm4, %v1342_v44, %v1344_v47 }
0x10bc   :  { %v1346_v48 = vpop.permute.xlu0 %1345 }
0x10bd   :  { %v1352_v49 = vsel %vm104_vm4, %v1344_v47, %v1346_v48 }
0x10be   :  { %1388 = vmatprep.subr.mxu1 %v1352_v49  ;;  %v1332_v51 = vpop.permute.xlu1 %1331 }
0x10bf   :  { %1389 = vmatpush1.msra.mxu1 %v1351_v50 }
0x10c0   :  { %v1338_v52 = vpop.permute.xlu0 %1337 }
0x10c1   :  { %v1349_v53 = vsel %vm104_vm4, %v1336_v46, %v1338_v52  ;;  %v1350_v54 = vsel %vm104_vm4, %v1338_v52, %v1340_v45 }
0x10c2   :  { %1390 = vmatprep.subr.mxu1 %v1350_v54  ;;  %v1330_v55 = vpop.permute.xlu1 %1329 }
0x10c3   :  { %1391 = vmatpush1.msra.mxu1 %v1349_v53  ;;  %v1347_v59 = vsel %vm104_vm4, %v1330_v55, %v1332_v51  ;;  %v1573_v55 = vld [vmem:[#allocation4 + $0x58] sm:$0xff] }
0x10c4   :  { %v1334_v56 = vpop.permute.xlu0 %1333 }
0x10c5   :  { %v1348_v57 = vsel %vm104_vm4, %v1332_v51, %v1334_v56 }
0x10c6   :  { %1392 = vmatprep.subr.mxu1 %v1348_v57 }
0x10c7   :  { %1393 = vmatpush1.msra.mxu1 %v1347_v59 }
0x10c8   :  { %2366 = vmatmul.mubr.msk.f32.vlgmr.msra.gmra.mxu1 %vm117_vm5, %v1297_v58  ;;  %v1462_v5 = vpop.permute.xlu0 %1461 }
0x10c9   :  { %1702 = vmatprep.mubr.f32.mxu1 %v2469_v1 }
0x1188   :  { %v1428_v60 = vpop.f32.mrf.mxu1 }
0x1189   :  { %v1433_v61 = vadd.f32 %v1428_v60, %v1291_v32 }
0x118a   :  { %v1430_v62 = vpop.f32.mrf.mxu1 }
0x118b   :  { %v2828_v63 = vmax.f32 %v1433_v61, 0.0  ;;  %v1434_v3 = vadd.f32 %v1430_v62, %v1293_v34 }
0x118d   :  { %v2830_v4 = vmax.f32 %v1434_v3, 0.0  ;;  %1457 = vrot.lane.b32.xlu0 %v2828_v63, %s2471_s24 }
0x118f   :  { %1459 = vrot.lane.b32.xlu1 %v2830_v4, %s2471_s24 }
0x1191   :  { %1451 = vrot.lane.b32.xlu0 %v2830_v4, %s2470_s1 }
0x1193   :  { %1449 = vrot.lane.b32.xlu1 %v2828_v63, %s2470_s1 }
0x11ff   :  { %v1458_v6 = vpop.permute.xlu0 %1457 }
0x1200   :  { %1480 = vrot.lane.b32.xlu1 %v1458_v6, %s2472_s0 }
0x1201   :  { %v1460_v7 = vpop.permute.xlu1 %1459 }
0x1202   :  { %v1463_v14 = vsel %vm80_vm3, %v1458_v6, %v1460_v7  ;;  %v1464_v16 = vsel %vm80_vm3, %v1460_v7, %v1462_v5 }
0x1203   :  { %v1452_v11 = vpop.permute.xlu0 %1451 }
0x1204   :  { %1478 = vrot.lane.b32.xlu1 %v1452_v11, %s2472_s0 }
0x1205   :  { %v1450_v13 = vpop.permute.xlu1 %1449 }
0x1206   :  { %1474 = vrot.lane.b32.xlu0 %v1450_v13, %s2472_s0  ;;  %v1453_v10 = vsel %vm69_vm2, %v1450_v13, %v1452_v11 }
0x1208   :  { %1482 = vrot.lane.b32.xlu1 %v1463_v14, %s2472_s0 }
0x120a   :  { %1484 = vrot.lane.b32.xlu0 %v1464_v16, %s2472_s0 }
0x120c   :  { %1470 = vrot.lane.b32.xlu1 %v2828_v63, %s2472_s0 }
0x120e   :  { %1476 = vrot.lane.b32.xlu0 %v1453_v10, %s2472_s0 }
0x1210   :  { %1468 = vrot.lane.b32.xlu1 %v2469_v1, %s2472_s0 }
0x1212   :  { %1472 = vrot.lane.b32.xlu0 %v2830_v4, %s2472_s0 }
0x1216   :  { %1598 = vrot.lane.b32.xlu0 %v2469_v1, %s2471_s24 }
0x1272   :  { %v1481_v12 = vpop.permute.xlu1 %1480 }
0x1276   :  { %v1479_v15 = vpop.permute.xlu1 %1478 }
0x1278   :  { %v1475_v17 = vpop.permute.xlu0 %1474 }
0x127a   :  { %v1483_v8 = vpop.permute.xlu1 %1482 }
0x127b   :  { %v1490_v20 = vsel %vm104_vm4, %v1481_v12, %v1483_v8 }
0x127c   :  { %v1485_v18 = vpop.permute.xlu0 %1484 }
0x127d   :  { %v1491_v19 = vsel %vm104_vm4, %v1483_v8, %v1485_v18 }
0x127e   :  { %1527 = vmatprep.subr.mxu0 %v1491_v19  ;;  %v1471_v9 = vpop.permute.xlu1 %1470 }
0x127f   :  { %1528 = vmatpush1.msra.mxu0 %v1490_v20 }
0x1280   :  { %v1477_v21 = vpop.permute.xlu0 %1476 }
0x1281   :  { %v1488_v22 = vsel %vm104_vm4, %v1475_v17, %v1477_v21  ;;  %v1489_v23 = vsel %vm104_vm4, %v1477_v21, %v1479_v15 }
0x1282   :  { %1529 = vmatprep.subr.mxu0 %v1489_v23  ;;  %v1469_v24 = vpop.permute.xlu1 %1468 }
0x1283   :  { %1530 = vmatpush1.msra.mxu0 %v1488_v22  ;;  %v1486_v28 = vsel %vm104_vm4, %v1469_v24, %v1471_v9  ;;  %v1714_v24 = vld [vmem:[#allocation4 + $0x60] sm:$0xff] }
0x1284   :  { %v1473_v25 = vpop.permute.xlu0 %1472 }
0x1285   :  { %v1487_v26 = vsel %vm104_vm4, %v1471_v9, %v1473_v25 }
0x1286   :  { %1531 = vmatprep.subr.mxu0 %v1487_v26 }
0x1287   :  { %1532 = vmatpush1.msra.mxu0 %v1486_v28 }
0x1288   :  { %2367 = vmatmul.mubr.msk.f32.vlgmr.msra.gmra.mxu0 %vm117_vm5, %v1438_v27  ;;  %v1599_v33 = vpop.permute.xlu0 %1598 }
0x1289   :  { %1841 = vmatprep.mubr.f32.mxu0 %v2469_v1 }
0x1348   :  { %v1567_v29 = vpop.f32.mrf.mxu0 }
0x1349   :  { %v1574_v30 = vmax.f32 %v1567_v29, 0.0 }
0x134a   :  { %v1569_v31 = vpop.f32.mrf.mxu0 }
0x134b   :  { %v1575_v32 = vmax.f32 %v1569_v31, 0.0  ;;  %1594 = vrot.lane.b32.xlu0 %v1574_v30, %s2471_s24 }
0x134d   :  { %1596 = vrot.lane.b32.xlu1 %v1575_v32, %s2471_s24 }
0x134f   :  { %1588 = vrot.lane.b32.xlu0 %v1575_v32, %s2470_s1 }
0x1351   :  { %1586 = vrot.lane.b32.xlu1 %v1574_v30, %s2470_s1 }
0x13bd   :  { %v1595_v34 = vpop.permute.xlu0 %1594 }
0x13be   :  { %1617 = vrot.lane.b32.xlu1 %v1595_v34, %s2472_s0 }
0x13bf   :  { %v1597_v35 = vpop.permute.xlu1 %1596 }
0x13c0   :  { %v1600_v38 = vsel %vm80_vm3, %v1595_v34, %v1597_v35  ;;  %v1601_v39 = vsel %vm80_vm3, %v1597_v35, %v1599_v33 }
0x13c1   :  { %v1589_v36 = vpop.permute.xlu0 %1588 }
0x13c2   :  { %1615 = vrot.lane.b32.xlu1 %v1589_v36, %s2472_s0 }
0x13c3   :  { %v1587_v37 = vpop.permute.xlu1 %1586 }
0x13c4   :  { %1611 = vrot.lane.b32.xlu0 %v1587_v37, %s2472_s0  ;;  %v1590_v40 = vsel %vm69_vm2, %v1587_v37, %v1589_v36 }
0x13c6   :  { %1619 = vrot.lane.b32.xlu1 %v1600_v38, %s2472_s0 }
0x13c8   :  { %1621 = vrot.lane.b32.xlu0 %v1601_v39, %s2472_s0 }
0x13ca   :  { %1607 = vrot.lane.b32.xlu1 %v1574_v30, %s2472_s0 }
0x13cc   :  { %1613 = vrot.lane.b32.xlu0 %v1590_v40, %s2472_s0 }
0x13ce   :  { %1605 = vrot.lane.b32.xlu1 %v2469_v1, %s2472_s0 }
0x13d0   :  { %1609 = vrot.lane.b32.xlu0 %v1575_v32, %s2472_s0 }
0x13d4   :  { %1737 = vrot.lane.b32.xlu0 %v2469_v1, %s2471_s24 }
0x1430   :  { %v1618_v41 = vpop.permute.xlu1 %1617 }
0x1434   :  { %v1616_v42 = vpop.permute.xlu1 %1615 }
0x1436   :  { %v1612_v43 = vpop.permute.xlu0 %1611 }
0x1438   :  { %v1620_v44 = vpop.permute.xlu1 %1619 }
0x1439   :  { %v1627_v47 = vsel %vm104_vm4, %v1618_v41, %v1620_v44 }
0x143a   :  { %v1622_v45 = vpop.permute.xlu0 %1621 }
0x143b   :  { %v1628_v46 = vsel %vm104_vm4, %v1620_v44, %v1622_v45 }
0x143c   :  { %1664 = vmatprep.subr.mxu1 %v1628_v46  ;;  %v1608_v48 = vpop.permute.xlu1 %1607 }
0x143d   :  { %1665 = vmatpush1.msra.mxu1 %v1627_v47 }
0x143e   :  { %v1614_v49 = vpop.permute.xlu0 %1613 }
0x143f   :  { %v1625_v50 = vsel %vm104_vm4, %v1612_v43, %v1614_v49  ;;  %v1626_v51 = vsel %vm104_vm4, %v1614_v49, %v1616_v42 }
0x1440   :  { %1666 = vmatprep.subr.mxu1 %v1626_v51  ;;  %v1606_v52 = vpop.permute.xlu1 %1605 }
0x1441   :  { %1667 = vmatpush1.msra.mxu1 %v1625_v50  ;;  %v1623_v56 = vsel %vm104_vm4, %v1606_v52, %v1608_v48  ;;  %v1849_v52 = vld [vmem:[#allocation4 + $0x68] sm:$0xff] }
0x1442   :  { %v1610_v53 = vpop.permute.xlu0 %1609 }
0x1443   :  { %v1624_v54 = vsel %vm104_vm4, %v1608_v48, %v1610_v53 }
0x1444   :  { %1668 = vmatprep.subr.mxu1 %v1624_v54 }
0x1445   :  { %1669 = vmatpush1.msra.mxu1 %v1623_v56 }
0x1446   :  { %2368 = vmatmul.mubr.msk.f32.vlgmr.msra.gmra.mxu1 %vm117_vm5, %v1573_v55 }
0x1447   :  { %1978 = vmatprep.mubr.f32.mxu1 %v2469_v1 }
0x1506   :  { %v1704_v57 = vpop.f32.mrf.mxu1 }
0x1507   :  { %v1709_v58 = vadd.f32 %v1704_v57, %v2828_v63  ;;  %v1738_v63 = vpop.permute.xlu0 %1737 }
0x1508   :  { %v1706_v59 = vpop.f32.mrf.mxu1 }
0x1509   :  { %v2893_v60 = vmax.f32 %v1709_v58, 0.0  ;;  %v1710_v61 = vadd.f32 %v1706_v59, %v2830_v4 }
0x150b   :  { %v2896_v62 = vmax.f32 %v1710_v61, 0.0  ;;  %1733 = vrot.lane.b32.xlu0 %v2893_v60, %s2471_s24 }
0x150d   :  { %1735 = vrot.lane.b32.xlu1 %v2896_v62, %s2471_s24 }
0x150f   :  { %1727 = vrot.lane.b32.xlu0 %v2896_v62, %s2470_s1 }
0x1511   :  { %1725 = vrot.lane.b32.xlu1 %v2893_v60, %s2470_s1 }
0x157d   :  { %v1734_v3 = vpop.permute.xlu0 %1733 }
0x157e   :  { %1756 = vrot.lane.b32.xlu1 %v1734_v3, %s2472_s0 }
0x157f   :  { %v1736_v5 = vpop.permute.xlu1 %1735 }
0x1580   :  { %v1739_v7 = vsel %vm80_vm3, %v1734_v3, %v1736_v5  ;;  %v1740_v11 = vsel %vm80_vm3, %v1736_v5, %v1738_v63 }
0x1581   :  { %v1728_v4 = vpop.permute.xlu0 %1727 }
0x1582   :  { %1754 = vrot.lane.b32.xlu1 %v1728_v4, %s2472_s0 }
0x1583   :  { %v1726_v6 = vpop.permute.xlu1 %1725 }
0x1584   :  { %1750 = vrot.lane.b32.xlu0 %v1726_v6, %s2472_s0  ;;  %v1729_v13 = vsel %vm69_vm2, %v1726_v6, %v1728_v4 }
0x1586   :  { %1758 = vrot.lane.b32.xlu1 %v1739_v7, %s2472_s0 }
0x1588   :  { %1760 = vrot.lane.b32.xlu0 %v1740_v11, %s2472_s0 }
0x158a   :  { %1746 = vrot.lane.b32.xlu1 %v2893_v60, %s2472_s0 }
0x158c   :  { %1752 = vrot.lane.b32.xlu0 %v1729_v13, %s2472_s0 }
0x158e   :  { %1744 = vrot.lane.b32.xlu1 %v2469_v1, %s2472_s0 }
0x1590   :  { %1748 = vrot.lane.b32.xlu0 %v2896_v62, %s2472_s0 }
0x1594   :  { %1874 = vrot.lane.b32.xlu0 %v2469_v1, %s2471_s24 }
0x15f0   :  { %v1757_v14 = vpop.permute.xlu1 %1756 }
0x15f4   :  { %v1755_v16 = vpop.permute.xlu1 %1754 }
0x15f6   :  { %v1751_v10 = vpop.permute.xlu0 %1750 }
0x15f8   :  { %v1759_v12 = vpop.permute.xlu1 %1758 }
0x15f9   :  { %v1766_v8 = vsel %vm104_vm4, %v1757_v14, %v1759_v12 }
0x15fa   :  { %v1761_v15 = vpop.permute.xlu0 %1760 }
0x15fb   :  { %v1767_v17 = vsel %vm104_vm4, %v1759_v12, %v1761_v15 }
0x15fc   :  { %1803 = vmatprep.subr.mxu0 %v1767_v17  ;;  %v1747_v18 = vpop.permute.xlu1 %1746 }
0x15fd   :  { %1804 = vmatpush1.msra.mxu0 %v1766_v8 }
0x15fe   :  { %v1753_v19 = vpop.permute.xlu0 %1752 }
0x15ff   :  { %v1764_v20 = vsel %vm104_vm4, %v1751_v10, %v1753_v19  ;;  %v1765_v9 = vsel %vm104_vm4, %v1753_v19, %v1755_v16 }
0x1600   :  { %1805 = vmatprep.subr.mxu0 %v1765_v9  ;;  %v1745_v21 = vpop.permute.xlu1 %1744 }
0x1601   :  { %1806 = vmatpush1.msra.mxu0 %v1764_v20  ;;  %v1762_v25 = vsel %vm104_vm4, %v1745_v21, %v1747_v18  ;;  %v1990_v21 = vld [vmem:[#allocation4 + $0x70] sm:$0xff] }
0x1602   :  { %v1749_v22 = vpop.permute.xlu0 %1748 }
0x1603   :  { %v1763_v23 = vsel %vm104_vm4, %v1747_v18, %v1749_v22 }
0x1604   :  { %1807 = vmatprep.subr.mxu0 %v1763_v23 }
0x1605   :  { %1808 = vmatpush1.msra.mxu0 %v1762_v25 }
0x1606   :  { %2369 = vmatmul.mubr.msk.f32.vlgmr.msra.gmra.mxu0 %vm117_vm5, %v1714_v24  ;;  %v1875_v30 = vpop.permute.xlu0 %1874 }
0x1607   :  { %2117 = vmatprep.mubr.f32.mxu0 %v2469_v1 }
0x16c6   :  { %v1843_v26 = vpop.f32.mrf.mxu0 }
0x16c7   :  { %v1850_v27 = vmax.f32 %v1843_v26, 0.0 }
0x16c8   :  { %v1845_v28 = vpop.f32.mrf.mxu0 }
0x16c9   :  { %v1851_v29 = vmax.f32 %v1845_v28, 0.0  ;;  %1870 = vrot.lane.b32.xlu0 %v1850_v27, %s2471_s24 }
0x16cb   :  { %1872 = vrot.lane.b32.xlu1 %v1851_v29, %s2471_s24 }
0x16cd   :  { %1864 = vrot.lane.b32.xlu0 %v1851_v29, %s2470_s1 }
0x16cf   :  { %1862 = vrot.lane.b32.xlu1 %v1850_v27, %s2470_s1 }
0x173b   :  { %v1871_v31 = vpop.permute.xlu0 %1870 }
0x173c   :  { %1893 = vrot.lane.b32.xlu1 %v1871_v31, %s2472_s0 }
0x173d   :  { %v1873_v32 = vpop.permute.xlu1 %1872 }
0x173e   :  { %v1876_v35 = vsel %vm80_vm3, %v1871_v31, %v1873_v32  ;;  %v1877_v36 = vsel %vm80_vm3, %v1873_v32, %v1875_v30 }
0x173f   :  { %v1865_v33 = vpop.permute.xlu0 %1864 }
0x1740   :  { %1891 = vrot.lane.b32.xlu1 %v1865_v33, %s2472_s0 }
0x1741   :  { %v1863_v34 = vpop.permute.xlu1 %1862 }
0x1742   :  { %1887 = vrot.lane.b32.xlu0 %v1863_v34, %s2472_s0  ;;  %v1866_v37 = vsel %vm69_vm2, %v1863_v34, %v1865_v33  ;;  %v2473_v34 = vmov 0  }
0x1743   :  { %2413 = vset.pattern.permute.xlu0 %v2473_v34 }
0x1744   :  { %1895 = vrot.lane.b32.xlu1 %v1876_v35, %s2472_s0 }
0x1746   :  { %1897 = vrot.lane.b32.xlu0 %v1877_v36, %s2472_s0  ;;  %v2265_v36 = vld [vmem:[%s3035_s2] sm:$0xff] }
0x1748   :  { %1883 = vrot.lane.b32.xlu1 %v1850_v27, %s2472_s0 }
0x174a   :  { %1889 = vrot.lane.b32.xlu0 %v1866_v37, %s2472_s0 }
0x174c   :  { %1881 = vrot.lane.b32.xlu1 %v2469_v1, %s2472_s0 }
0x174e   :  { %1885 = vrot.lane.b32.xlu0 %v1851_v29, %s2472_s0 }
0x1752   :  { %2013 = vrot.lane.b32.xlu0 %v2469_v1, %s2471_s24 }
0x17ae   :  { %v1894_v38 = vpop.permute.xlu1 %1893 }
0x17b2   :  { %v1892_v39 = vpop.permute.xlu1 %1891 }
0x17b4   :  { %v1888_v40 = vpop.permute.xlu0 %1887 }
0x17b6   :  { %v1896_v41 = vpop.permute.xlu1 %1895 }
0x17b7   :  { %v1903_v44 = vsel %vm104_vm4, %v1894_v38, %v1896_v41 }
0x17b8   :  { %v1898_v42 = vpop.permute.xlu0 %1897 }
0x17b9   :  { %v1904_v43 = vsel %vm104_vm4, %v1896_v41, %v1898_v42 }
0x17ba   :  { %1940 = vmatprep.subr.mxu1 %v1904_v43  ;;  %v1884_v45 = vpop.permute.xlu1 %1883 }
0x17bb   :  { %1941 = vmatpush1.msra.mxu1 %v1903_v44 }
0x17bc   :  { %v1890_v46 = vpop.permute.xlu0 %1889 }
0x17bd   :  { %v1901_v47 = vsel %vm104_vm4, %v1888_v40, %v1890_v46  ;;  %v1902_v48 = vsel %vm104_vm4, %v1890_v46, %v1892_v39 }
0x17be   :  { %1942 = vmatprep.subr.mxu1 %v1902_v48  ;;  %v1882_v49 = vpop.permute.xlu1 %1881 }
0x17bf   :  { %1943 = vmatpush1.msra.mxu1 %v1901_v47  ;;  %v1899_v53 = vsel %vm104_vm4, %v1882_v49, %v1884_v45 }
0x17c0   :  { %v1886_v50 = vpop.permute.xlu0 %1885 }
0x17c1   :  { %v1900_v51 = vsel %vm104_vm4, %v1884_v45, %v1886_v50  ;;  %v2125_v50 = vld [vmem:[#allocation4 + $0x78] sm:$0xff] }
0x17c2   :  { %1944 = vmatprep.subr.mxu1 %v1900_v51 }
0x17c3   :  { %1945 = vmatpush1.msra.mxu1 %v1899_v53 }
0x17c4   :  { %2370 = vmatmul.mubr.msk.f32.vlgmr.msra.gmra.mxu1 %vm117_vm5, %v1849_v52 }
0x17c5   :  { %2254 = vmatprep.mubr.f32.mxu1 %v2469_v1 }
0x1884   :  { %v1980_v54 = vpop.f32.mrf.mxu1 }
0x1885   :  { %v1985_v55 = vadd.f32 %v1980_v54, %v2893_v60  ;;  %v2014_v60 = vpop.permute.xlu0 %2013 }
0x1886   :  { %v1982_v56 = vpop.f32.mrf.mxu1 }
0x1887   :  { %v2959_v57 = vmax.f32 %v1985_v55, 0.0  ;;  %v1986_v58 = vadd.f32 %v1982_v56, %v2896_v62 }
0x1889   :  { %v2962_v59 = vmax.f32 %v1986_v58, 0.0  ;;  %2009 = vrot.lane.b32.xlu0 %v2959_v57, %s2471_s24 }
0x188b   :  { %2011 = vrot.lane.b32.xlu1 %v2962_v59, %s2471_s24 }
0x188d   :  { %2003 = vrot.lane.b32.xlu0 %v2962_v59, %s2470_s1 }
0x188f   :  { %2001 = vrot.lane.b32.xlu1 %v2959_v57, %s2470_s1 }
0x18fb   :  { %v2010_v61 = vpop.permute.xlu0 %2009 }
0x18fc   :  { %2032 = vrot.lane.b32.xlu1 %v2010_v61, %s2472_s0 }
0x18fd   :  { %v2012_v63 = vpop.permute.xlu1 %2011 }
0x18fe   :  { %v2015_v5 = vsel %vm80_vm3, %v2010_v61, %v2012_v63  ;;  %v2016_v4 = vsel %vm80_vm3, %v2012_v63, %v2014_v60 }
0x18ff   :  { %v2004_v62 = vpop.permute.xlu0 %2003 }
0x1900   :  { %2030 = vrot.lane.b32.xlu1 %v2004_v62, %s2472_s0 }
0x1901   :  { %v2002_v3 = vpop.permute.xlu1 %2001 }
0x1902   :  { %2026 = vrot.lane.b32.xlu0 %v2002_v3, %s2472_s0  ;;  %v2005_v6 = vsel %vm69_vm2, %v2002_v3, %v2004_v62 }
0x1904   :  { %2034 = vrot.lane.b32.xlu1 %v2015_v5, %s2472_s0 }
0x1906   :  { %2036 = vrot.lane.b32.xlu0 %v2016_v4, %s2472_s0 }
0x1908   :  { %2022 = vrot.lane.b32.xlu1 %v2959_v57, %s2472_s0 }
0x190a   :  { %2028 = vrot.lane.b32.xlu0 %v2005_v6, %s2472_s0 }
0x190c   :  { %2020 = vrot.lane.b32.xlu1 %v2469_v1, %s2472_s0 }
0x190e   :  { %2024 = vrot.lane.b32.xlu0 %v2962_v59, %s2472_s0 }
0x1912   :  { %2150 = vrot.lane.b32.xlu0 %v2469_v1, %s2471_s24 }
0x196e   :  { %v2033_v7 = vpop.permute.xlu1 %2032 }
0x1972   :  { %v2031_v11 = vpop.permute.xlu1 %2030 }
0x1974   :  { %v2027_v13 = vpop.permute.xlu0 %2026 }
0x1976   :  { %v2035_v14 = vpop.permute.xlu1 %2034 }
0x1977   :  { %v2042_v12 = vsel %vm104_vm4, %v2033_v7, %v2035_v14 }
0x1978   :  { %v2037_v16 = vpop.permute.xlu0 %2036 }
0x1979   :  { %v2043_v10 = vsel %vm104_vm4, %v2035_v14, %v2037_v16 }
0x197a   :  { %2079 = vmatprep.subr.mxu0 %v2043_v10  ;;  %v2023_v15 = vpop.permute.xlu1 %2022 }
0x197b   :  { %2080 = vmatpush1.msra.mxu0 %v2042_v12 }
0x197c   :  { %v2029_v17 = vpop.permute.xlu0 %2028 }
0x197d   :  { %v2040_v8 = vsel %vm104_vm4, %v2027_v13, %v2029_v17  ;;  %v2041_v18 = vsel %vm104_vm4, %v2029_v17, %v2031_v11 }
0x197e   :  { %2081 = vmatprep.subr.mxu0 %v2041_v18  ;;  %v2021_v19 = vpop.permute.xlu1 %2020 }
0x197f   :  { %2082 = vmatpush1.msra.mxu0 %v2040_v8  ;;  %v2038_v22 = vsel %vm104_vm4, %v2021_v19, %v2023_v15 }
0x1980   :  { %v2025_v20 = vpop.permute.xlu0 %2024 }
0x1981   :  { %v2039_v9 = vsel %vm104_vm4, %v2023_v15, %v2025_v20 }
0x1982   :  { %2083 = vmatprep.subr.mxu0 %v2039_v9 }
0x1983   :  { %2084 = vmatpush1.msra.mxu0 %v2038_v22 }
0x1984   :  { %2371 = vmatmul.mubr.msk.f32.vlgmr.msra.gmra.mxu0 %vm117_vm5, %v1990_v21  ;;  %v2151_v27 = vpop.permute.xlu0 %2150 }
0x1a44   :  { %v2119_v23 = vpop.f32.mrf.mxu0 }
0x1a45   :  { %v2126_v24 = vmax.f32 %v2119_v23, 0.0 }
0x1a46   :  { %v2121_v25 = vpop.f32.mrf.mxu0 }
0x1a47   :  { %v2127_v26 = vmax.f32 %v2121_v25, 0.0  ;;  %2146 = vrot.lane.b32.xlu0 %v2126_v24, %s2471_s24 }
0x1a49   :  { %2148 = vrot.lane.b32.xlu1 %v2127_v26, %s2471_s24 }
0x1a4b   :  { %2140 = vrot.lane.b32.xlu0 %v2127_v26, %s2470_s1 }
0x1a4d   :  { %2138 = vrot.lane.b32.xlu1 %v2126_v24, %s2470_s1 }
0x1ab9   :  { %v2147_v28 = vpop.permute.xlu0 %2146 }
0x1aba   :  { %2169 = vrot.lane.b32.xlu1 %v2147_v28, %s2472_s0 }
0x1abb   :  { %v2149_v29 = vpop.permute.xlu1 %2148 }
0x1abc   :  { %v2152_v32 = vsel %vm80_vm3, %v2147_v28, %v2149_v29  ;;  %v2153_v33 = vsel %vm80_vm3, %v2149_v29, %v2151_v27 }
0x1abd   :  { %v2141_v30 = vpop.permute.xlu0 %2140 }
0x1abe   :  { %2167 = vrot.lane.b32.xlu1 %v2141_v30, %s2472_s0 }
0x1abf   :  { %v2139_v31 = vpop.permute.xlu1 %2138 }
0x1ac0   :  { %2163 = vrot.lane.b32.xlu0 %v2139_v31, %s2472_s0  ;;  %v2142_v35 = vsel %vm69_vm2, %v2139_v31, %v2141_v30 }
0x1ac2   :  { %2171 = vrot.lane.b32.xlu1 %v2152_v32, %s2472_s0 }
0x1ac4   :  { %2173 = vrot.lane.b32.xlu0 %v2153_v33, %s2472_s0 }
0x1ac6   :  { %2159 = vrot.lane.b32.xlu1 %v2126_v24, %s2472_s0 }
0x1ac8   :  { %2165 = vrot.lane.b32.xlu0 %v2142_v35, %s2472_s0 }
0x1aca   :  { %2157 = vrot.lane.b32.xlu1 %v2469_v1, %s2472_s0 }
0x1acc   :  { %2161 = vrot.lane.b32.xlu0 %v2127_v26, %s2472_s0  ;;  %v2474_v26 = vmov 1966171168  }
0x1acd   :  { %v2321_v27 = vunpack.c.l.s4 %v2474_v26 }
0x1acf   :  { %v2322_v34 = vunpack.c.0.s8 %v2321_v27 }
0x1ad0   :  { %2268 = vperm.xlu0 %2413, %v2265_v36  }
0x1b2c   :  { %v2170_v37 = vpop.permute.xlu1 %2169 }
0x1b30   :  { %v2168_v38 = vpop.permute.xlu1 %2167 }
0x1b32   :  { %v2164_v39 = vpop.permute.xlu0 %2163 }
0x1b34   :  { %v2172_v40 = vpop.permute.xlu1 %2171 }
0x1b35   :  { %v2179_v43 = vsel %vm104_vm4, %v2170_v37, %v2172_v40 }
0x1b36   :  { %v2174_v41 = vpop.permute.xlu0 %2173 }
0x1b37   :  { %v2180_v42 = vsel %vm104_vm4, %v2172_v40, %v2174_v41  ;;  %v2325_v40 = vsub.s32 %v2322_v34, %v2507_v2 }
0x1b38   :  { %2216 = vmatprep.subr.mxu1 %v2180_v42  ;;  %v2160_v44 = vpop.permute.xlu1 %2159 }
0x1b39   :  { %2217 = vmatpush1.msra.mxu1 %v2179_v43 }
0x1b3a   :  { %v2166_v1 = vpop.permute.xlu0 %2165 }
0x1b3b   :  { %v2177_v45 = vsel %vm104_vm4, %v2164_v39, %v2166_v1  ;;  %v2178_v46 = vsel %vm104_vm4, %v2166_v1, %v2168_v38 }
0x1b3c   :  { %2218 = vmatprep.subr.mxu1 %v2178_v46  ;;  %v2158_v47 = vpop.permute.xlu1 %2157 }
0x1b3d   :  { %2219 = vmatpush1.msra.mxu1 %v2177_v45  ;;  %v2175_v51 = vsel %vm104_vm4, %v2158_v47, %v2160_v44 }
0x1b3e   :  { %v2162_v48 = vpop.permute.xlu0 %2161 }
0x1b3f   :  { %v2176_v49 = vsel %vm104_vm4, %v2160_v44, %v2162_v48 }
0x1b40   :  { %2220 = vmatprep.subr.mxu1 %v2176_v49 }
0x1b41   :  { %2221 = vmatpush1.msra.mxu1 %v2175_v51 }
0x1b42   :  { %2372 = vmatmul.mubr.msk.f32.vlgmr.msra.gmra.mxu1 %vm117_vm5, %v2125_v50 }
0x1b4b   :  { %v2269_v55 = vpop.permute.xlu0 %2268 }
0x1c02   :  { %v2256_v52 = vpop.f32.mrf.mxu1 }
0x1c03   :  { %v2261_v53 = vadd.f32 %v2256_v52, %v2959_v57  ;;  %v2286_v57 = vstv %s3036_s3  ;;  %s2475_s3 = smov [#allocation7]  }
0x1c04   :  { %v2258_v54 = vpop.f32.mrf.mxu1  ;;  %s2346_s28 = sshll.u32 %s2475_s3, 4  ;;  %s2347_s28 = int_to_ptr.vmem [resolvable:$true] %s2346_s28 }
0x1c05   :  { %v2263_v56 = vmax.f32 %v2261_v53, 0.0  ;;  %v2262_v58 = vadd.f32 %v2258_v54, %v2962_v59  ;;  %s2442_s29 = scalar_lea.vmem %s2347_s28, 32  ;;  %p2447_p6 = scmp.lt.s32.totalorder %s2347_s28, %s2347_s28 }
0x1c06   :  { %p2443_p5 = scmp.ne.s32.totalorder %s2347_s28, %s2442_s29  ;;  %p2448_p7 = scmp.lt.s32.totalorder %s2442_s29, %s2442_s29 }
0x1c07   :  { %v2264_v60 = vmax.f32 %v2262_v58, 0.0  ;;  %v2271_v61 = vmul.f32 %v2269_v55, %v2263_v56 }
0x1c08   :  { %p2449_p8 = por %p2448_p7, %p2447_p6 }
0x1c09   :  { %v2272_v63 = vmul.f32 %v2269_v55, %v2264_v60  ;;  %v2273_v62 = vrot.slane %v2271_v61, 4 }
0x1c0a   :  { %p2450_p9 = pnand %p2449_p8, %p2443_p5 }
0x1c0b   :  { %v2274_v3 = vadd.f32 %v2273_v62, %v2271_v61  ;;  %v2279_v5 = vrot.slane %v2272_v63, 4 }
0x1c0d   :  { %v2275_v4 = vrot.slane %v2274_v3, 2  ;;  %v2280_v6 = vadd.f32 %v2279_v5, %v2272_v63 }
0x1c0f   :  { %v2276_v7 = vadd.f32 %v2275_v4, %v2274_v3  ;;  %v2281_v11 = vrot.slane %v2280_v6, 2 }
0x1c11   :  { %v2277_v13 = vrot.slane %v2276_v7, 1  ;;  %v2282_v14 = vadd.f32 %v2281_v11, %v2280_v6 }
0x1c13   :  { %v2278_v16 = vadd.f32 %v2277_v13, %v2276_v7  ;;  %v2283_v10 = vrot.slane %v2282_v14, 1 }
0x1c15   :  { %v2284_v12 = vadd.f32 %v2283_v10, %v2282_v14  ;;  %v2287_v59 = vadd.f32 %v2286_v57, %v2278_v16 }
0x1c17   :  { %v2288_v15 = vadd.f32 %v2286_v57, %v2284_v12  ;;  %v2291_v17 = vmin.f32 %v2287_v59, 20.0  ;;  %vm2289_vm8 = vcmp.gt.f32.partialorder %v2287_v59, 20.0 }
0x1c19   :  { %v2292_v8 = vmin.f32 %v2288_v15, 20.0  ;;  %v2293_v18 = vmul.f32 1.442695, %v2291_v17  ;;  %vm2290_vm9 = vcmp.gt.f32.partialorder %v2288_v15, 20.0 }
0x1c1b   :  { %2414 = vpow2.f32 %v2293_v18  ;;  %v2295_v19 = vmul.f32 1.442695, %v2292_v8 }
0x1c1d   :  { %2416 = vpow2.f32 %v2295_v19 }
0x1c28   :  { %v2415_v20 = vpop.eup %2414 }
0x1c29   :  { %v2297_v9 = vadd.f32 1.0, %v2415_v20  ;;  %v2300_v23 = vmul.f32 -0.5, %v2415_v20  ;;  %v2303_v28 = vand.u32 2147483647, %v2415_v20 }
0x1c2a   :  { %v2417_v21 = vpop.eup %2416 }
0x1c2b   :  { %2418 = vlog2.f32 %v2297_v9  ;;  %v2306_v22 = vadd.f32 1.0, %v2417_v21  ;;  %v2309_v24 = vmul.f32 -0.5, %v2417_v21  ;;  %v2301_v25 = vadd.f32 1.0, %v2300_v23 }
0x1c2c   :  { %v2312_v31 = vand.u32 2147483647, %v2417_v21  ;;  %vm2304_vm6 = vcmp.lt.f32.partialorder %v2303_v28, 0.0004427343 }
0x1c2d   :  { %2420 = vlog2.f32 %v2306_v22  ;;  %v2310_v29 = vadd.f32 1.0, %v2309_v24  ;;  %v2302_v33 = vmul.f32 %v2415_v20, %v2301_v25 }
0x1c2e   :  { %vm2313_vm7 = vcmp.lt.f32.partialorder %v2312_v31, 0.0004427343 }
0x1c2f   :  { %v2311_v38 = vmul.f32 %v2417_v21, %v2310_v29 }
0x1c38   :  { %v2419_v30 = vpop.eup %2418 }
0x1c39   :  { %v2299_v32 = vmul.f32 0.6931472, %v2419_v30 }
0x1c3a   :  { %v2421_v35 = vpop.eup %2420 }
0x1c3b   :  { %v2305_v36 = vsel %vm2304_vm6, %v2302_v33, %v2299_v32  ;;  %v2308_v37 = vmul.f32 0.6931472, %v2421_v35 }
0x1c3c   :  { %v2315_v41 = vsel %vm2289_vm8, %v2287_v59, %v2305_v36 }
0x1c3d   :  { %v2314_v39 = vsel %vm2313_vm7, %v2311_v38, %v2308_v37 }
0x1c3e   :  { %v2316_v42 = vsel %vm2290_vm9, %v2288_v15, %v2314_v39 }
0x1c3f   :  { %v2319_v43 = vcombine.low %v2315_v41, %v2316_v42 }
0x1c41   :  { %v2326_v44 = vrot.slane %v2319_v43, %v2325_v40 }
0x1c43   :  { %v2333_v1 = vrot.slane %v2326_v44, %v2325_v40 }
0x1c45   :  { %2339 = vst.msk [vmem:[#allocation7] sm:$0x3] %vm2337_vm10, %v2333_v1 }
0x1c46   :  { %2453 = shalt.err (!%p2450_p9)
}
0x1c47   :  { %2349 = dma.vmem_to_hbm [thread:$0]  %s2347_s28, 32, %s3037_s4, [#allocation6]  }
0x1c48   :  { %2464 = dma.done.wait [#allocation6], 32  }
0x1c49   :  { %2465 = vsyncadd [#allocation6], 4294967264 }
0x1c4a   :  { %2353 = vsyncpa [#allocation5], 1 }
0x1c4b   :  { %2354 = vsyncpa [#allocation6], 1 }

</bundles_post_ra>
